<compile_context>
chip_gen: v7x
topology: tpu7x:2x2x1
jax: 0.10.0
libtpu: 0.0.40
codegen_flags: <defaults>
</compile_context>

<pallas_src>
import functools

import jax
import jax.numpy as jnp
from jax.experimental import pallas as pl
from jax.experimental.pallas import tpu as pltpu

_VMEM_LIMIT = 32 * 1024 * 1024


# ------------------------------ small helpers -------------------------------

def _rup(n, m):
    return ((n + m - 1) // m) * m


def _r128(n):
    return _rup(n, 128)


def _pick_row_tile(m, pref=1024):
    """Row tile: multiple of 8, at most `pref` (no artificial min grid)."""
    return min(_rup(m, 8), pref)


def _pick_group_tile(g, k, pref_rows=2048):
    """Group tile so that tile_g * K ~= pref_rows expanded rows per step."""
    target = max(8, _rup(max(1, pref_rows // k), 8))
    return min(_rup(g, 8), target)


def _concat_pad(parts, cin_p):
    """Concat feature pieces (cast to bf16) and fold the channel pad to the
    stack's cin (a multiple of 16) into the same single concat copy."""
    parts = [p.astype(jnp.bfloat16) for p in parts]
    width = sum(p.shape[-1] for p in parts)
    if width < cin_p:
        parts.append(jnp.zeros(parts[0].shape[:-1] + (cin_p - width,), jnp.bfloat16))
    return jnp.concatenate(parts, axis=-1)


# ----------------------------- Pallas kernels -------------------------------

def _mlp_stack_kernel(*refs, n_layers):
    """Chained (matmul + bias + ReLU) x n_layers on a VMEM-resident row tile.

    Input/weights bf16, f32 accumulation, bf16 store (one cast per layer)."""
    x_ref = refs[0]
    o_ref = refs[-1]
    h = x_ref[...]                                             # bf16 [tile, cin_p]
    for l in range(n_layers):
        w = refs[1 + 2 * l][...]                               # bf16 [cin_p, cout_p]
        b = refs[2 + 2 * l][...]                               # f32  [1, cout_p]
        h = jnp.maximum(jnp.dot(h, w, preferred_element_type=jnp.float32) + b, 0.0)
        if l < n_layers - 1:
            h = h.astype(jnp.bfloat16)
    o_ref[...] = h.astype(o_ref.dtype)


def fused_mlp(x, layers_p):
    """x: [M, cin_p] bf16 (channels already padded to the stack's cin_p).
    Returns [M, cout_p] bf16 (cout_p is a multiple of 128, lane-dense)."""
    M, C0p = x.shape
    assert C0p == layers_p[0][0].shape[0]
    Coutp = layers_p[-1][0].shape[1]
    tile_m = _pick_row_tile(M)
    grid = pl.cdiv(M, tile_m)

    in_specs = [pl.BlockSpec((tile_m, C0p), lambda i: (i, 0))]
    args = [x]
    for w, b in layers_p:
        in_specs.append(pl.BlockSpec(w.shape, lambda i: (0, 0)))
        in_specs.append(pl.BlockSpec(b.shape, lambda i: (0, 0)))
        args += [w, b]

    flops = 2 * M * sum(w.shape[0] * w.shape[1] for w, _ in layers_p)
    bytes_accessed = (int(x.size) * 2 + M * Coutp * 2
                      + sum(int(w.size) * 2 + int(b.size) * 4 for w, b in layers_p))

    return pl.pallas_call(
        functools.partial(_mlp_stack_kernel, n_layers=len(layers_p)),
        out_shape=jax.ShapeDtypeStruct((M, Coutp), jnp.bfloat16),
        grid=(grid,),
        in_specs=in_specs,
        out_specs=pl.BlockSpec((tile_m, Coutp), lambda i: (i, 0)),
        compiler_params=pltpu.CompilerParams(
            dimension_semantics=("parallel",),
            vmem_limit_bytes=_VMEM_LIMIT),
        cost_estimate=pl.CostEstimate(flops=int(flops), transcendentals=0,
                                      bytes_accessed=int(bytes_accessed)),
    )(*args)


def _sa_stack_kernel(*refs, n_layers):
    """SA MLP stack + max-pool over the neighbor axis, fully in VMEM."""
    x_ref = refs[0]                        # bf16 [tile_g, K, cin_p]
    o_ref = refs[-1]                       # bf16 [tile_g, cout_p]
    tile_g, K, C0p = x_ref.shape
    h = x_ref[...].reshape(tile_g * K, C0p)
    for l in range(n_layers):
        w = refs[1 + 2 * l][...]
        b = refs[2 + 2 * l][...]
        h = jnp.maximum(jnp.dot(h, w, preferred_element_type=jnp.float32) + b, 0.0)
        if l < n_layers - 1:
            h = h.astype(jnp.bfloat16)
    co = h.shape[-1]
    o_ref[...] = jnp.max(h.reshape(tile_g, K, co), axis=1).astype(o_ref.dtype)


def fused_sa_mlp_max(feat, layers_p):
    """feat: [G, K, cin_p] bf16 -> pooled [G, cout_p] bf16 (MLP + max over K)."""
    G, K, C0p = feat.shape
    assert C0p == layers_p[0][0].shape[0]
    Coutp = layers_p[-1][0].shape[1]
    tile_g = _pick_group_tile(G, K)
    grid = pl.cdiv(G, tile_g)

    in_specs = [pl.BlockSpec((tile_g, K, C0p), lambda i: (i, 0, 0))]
    args = [feat]
    for w, b in layers_p:
        in_specs.append(pl.BlockSpec(w.shape, lambda i: (0, 0)))
        in_specs.append(pl.BlockSpec(b.shape, lambda i: (0, 0)))
        args += [w, b]

    flops = 2 * G * K * sum(w.shape[0] * w.shape[1] for w, _ in layers_p)
    bytes_accessed = (int(feat.size) * 2 + G * Coutp * 2
                      + sum(int(w.size) * 2 + int(b.size) * 4 for w, b in layers_p))

    return pl.pallas_call(
        functools.partial(_sa_stack_kernel, n_layers=len(layers_p)),
        out_shape=jax.ShapeDtypeStruct((G, Coutp), jnp.bfloat16),
        grid=(grid,),
        in_specs=in_specs,
        out_specs=pl.BlockSpec((tile_g, Coutp), lambda i: (i, 0)),
        compiler_params=pltpu.CompilerParams(
            dimension_semantics=("parallel",),
            vmem_limit_bytes=_VMEM_LIMIT),
        cost_estimate=pl.CostEstimate(flops=int(flops), transcendentals=0,
                                      bytes_accessed=int(bytes_accessed)),
    )(*args)


def _heads_kernel(f_ref, w1_ref, b1_ref, w2_ref, b2_ref, sem_ref, shift_ref,
                  *, num_class, kp):
    """Both prediction heads with one 256-wide first-layer dot, one
    block-diagonal 256x256 second-layer dot, and fused log_softmax."""
    f = f_ref[...]                                                 # bf16 [tile, 16]
    h = jnp.dot(f, w1_ref[...], preferred_element_type=jnp.float32) + b1_ref[...]
    h = jnp.maximum(h, 0.0).astype(jnp.bfloat16)                   # dropout = identity (eval)

    out2 = jnp.dot(h, w2_ref[...], preferred_element_type=jnp.float32) + b2_ref[...]

    logits = out2[:, :kp]
    lane = jax.lax.broadcasted_iota(jnp.int32, logits.shape, 1)
    logits = jnp.where(lane < num_class, logits, -1e30)            # mask padded class lanes
    m = jnp.max(logits, axis=-1, keepdims=True)
    s = logits - m
    lse = jnp.log(jnp.sum(jnp.exp(s), axis=-1, keepdims=True))
    sem_ref[...] = (s - lse).astype(sem_ref.dtype)

    shift_ref[...] = out2[:, kp:].astype(shift_ref.dtype)


def fused_heads(feat, hp):
    """feat: [M, 16] bf16 -> (log-softmax logits [M, num_class] f32,
    shift vectors [M, D+C] f32)."""
    num_class, shift_dim = hp["num_class"], hp["shift_dim"]
    M, C0p = feat.shape
    kp = hp["w2cat"].shape[1] // 2
    tile_m = _pick_row_tile(M)
    grid = pl.cdiv(M, tile_m)

    flops = 2 * M * (C0p * hp["w1cat"].shape[1] + 2 * kp * 2 * kp)
    bytes_accessed = (int(feat.size) * 2 + M * 2 * kp * 4
                      + int(hp["w1cat"].size) * 2 + int(hp["b1cat"].size) * 4
                      + int(hp["w2cat"].size) * 2 + int(hp["b2cat"].size) * 4)

    sem, shift = pl.pallas_call(
        functools.partial(_heads_kernel, num_class=num_class, kp=kp),
        out_shape=(jax.ShapeDtypeStruct((M, kp), jnp.float32),
                   jax.ShapeDtypeStruct((M, kp), jnp.float32)),
        grid=(grid,),
        in_specs=[
            pl.BlockSpec((tile_m, C0p), lambda i: (i, 0)),
            pl.BlockSpec(hp["w1cat"].shape, lambda i: (0, 0)),
            pl.BlockSpec(hp["b1cat"].shape, lambda i: (0, 0)),
            pl.BlockSpec(hp["w2cat"].shape, lambda i: (0, 0)),
            pl.BlockSpec(hp["b2cat"].shape, lambda i: (0, 0)),
        ],
        out_specs=(pl.BlockSpec((tile_m, kp), lambda i: (i, 0)),
                   pl.BlockSpec((tile_m, kp), lambda i: (i, 0))),
        compiler_params=pltpu.CompilerParams(
            dimension_semantics=("parallel",),
            vmem_limit_bytes=_VMEM_LIMIT),
        cost_estimate=pl.CostEstimate(flops=int(flops), transcendentals=int(M * kp),
                                      bytes_accessed=int(bytes_accessed)),
    )(feat, hp["w1cat"], hp["b1cat"], hp["w2cat"], hp["b2cat"])
    return sem[:, :num_class], shift[:, :shift_dim]


def _loss_kernel(logp_ref, oh_ref, gt_ref, pr_ref, acc_ref, *, tile_m, n_valid):
    """Reduce both get_loss terms in-kernel into a (1,128) accumulator:
    lane 0 = sum of per-point NLL, lane 1 = sum of weighted shift distances."""
    i = pl.program_id(0)

    @pl.when(i == 0)
    def _():
        acc_ref[...] = jnp.zeros_like(acc_ref)

    row = jax.lax.broadcasted_iota(jnp.int32, (tile_m, 1), 0) + i * tile_m
    row_ok = row < n_valid

    nll = -jnp.sum(logp_ref[...] * oh_ref[...], axis=-1, keepdims=True)       # [tile,1]
    gt = gt_ref[...]
    diff = gt - pr_ref[...]
    w = jnp.minimum(jnp.sqrt(jnp.sum(gt * gt, axis=-1, keepdims=True)), 1.0)
    st = jnp.sqrt(jnp.sum(diff * diff, axis=-1, keepdims=True)) * w           # [tile,1]

    nll_s = jnp.sum(jnp.where(row_ok, nll, 0.0), axis=0, keepdims=True)       # [1,1]
    st_s = jnp.sum(jnp.where(row_ok, st, 0.0), axis=0, keepdims=True)         # [1,1]

    lane = jax.lax.broadcasted_iota(jnp.int32, acc_ref.shape, 1)
    acc_ref[...] += (jnp.where(lane == 0, nll_s, 0.0)
                     + jnp.where(lane == 1, st_s, 0.0))


def pallas_loss_sums(logp, onehot, gt, pred):
    """Returns (sum of NLL terms, sum of weighted shift-distance terms)."""
    M = logp.shape[0]
    tile_m = _pick_row_tile(M)
    grid = pl.cdiv(M, tile_m)
    acc = pl.pallas_call(
        functools.partial(_loss_kernel, tile_m=tile_m, n_valid=M),
        out_shape=jax.ShapeDtypeStruct((1, 128), jnp.float32),
        grid=(grid,),
        in_specs=[pl.BlockSpec((tile_m, logp.shape[1]), lambda i: (i, 0)),
                  pl.BlockSpec((tile_m, onehot.shape[1]), lambda i: (i, 0)),
                  pl.BlockSpec((tile_m, gt.shape[1]), lambda i: (i, 0)),
                  pl.BlockSpec((tile_m, pred.shape[1]), lambda i: (i, 0))],
        out_specs=pl.BlockSpec((1, 128), lambda i: (0, 0)),
        compiler_params=pltpu.CompilerParams(
            dimension_semantics=("arbitrary",),
            vmem_limit_bytes=_VMEM_LIMIT),
    )(logp, onehot, gt, pred)
    return acc[0, 0], acc[0, 1]


# ----------------------- plain-JAX glue (sampling etc.) ---------------------

def square_distance(src, dst):
    return (jnp.sum(src * src, -1)[:, :, None]
            + jnp.sum(dst * dst, -1)[:, None, :]
            - 2.0 * jnp.einsum("bnc,bmc->bnm", src, dst))


def index_points(points, idx):
    B = points.shape[0]
    batch_idx = jnp.arange(B).reshape((B,) + (1,) * (idx.ndim - 1))
    return points[batch_idx, idx]


def farthest_point_sample(xyz, npoint):
    # TODO(synk): PyTorch initializes the first farthest point randomly; we use
    # index 0 deterministically for reproducibility.
    B, N, _ = xyz.shape

    def body(i, carry):
        distance, farthest, centroids = carry
        centroids = centroids.at[:, i].set(farthest)
        centroid = xyz[jnp.arange(B), farthest][:, None, :]
        dist = jnp.sum((xyz - centroid) ** 2, -1)
        distance = jnp.minimum(distance, dist)
        farthest = jnp.argmax(distance, -1).astype(jnp.int32)
        return distance, farthest, centroids

    distance = jnp.full((B, N), 1e10, jnp.float32)
    farthest = jnp.zeros((B,), jnp.int32)
    centroids = jnp.zeros((B, npoint), jnp.int32)
    _, _, centroids = jax.lax.fori_loop(0, npoint, body,
                                        (distance, farthest, centroids))
    return centroids


def query_ball_point(radius, nsample, xyz, new_xyz):
    B, N, _ = xyz.shape
    S = new_xyz.shape[1]
    sqrdists = square_distance(new_xyz, xyz)
    group_idx = jnp.broadcast_to(
        jnp.arange(N, dtype=jnp.int32)[None, None, :], (B, S, N))
    group_idx = jnp.where(sqrdists > radius ** 2, N, group_idx)
    group_idx = jnp.sort(group_idx, axis=-1)[:, :, :nsample]
    group_first = jnp.broadcast_to(group_idx[:, :, :1], (B, S, nsample))
    group_idx = jnp.where(group_idx == N, group_first, group_idx)
    return group_idx


# --------------------------- PointNet++ modules -----------------------------

def set_abstraction(xyz, points, p):
    B, N, D = xyz.shape
    S, radius, K = p["npoint"], p["radius"], p["nsample"]
    fps_idx = farthest_point_sample(xyz, S)
    new_xyz = index_points(xyz, fps_idx)
    idx = query_ball_point(radius, K, xyz, new_xyz)
    grouped_xyz = index_points(xyz, idx) - new_xyz[:, :, None, :]
    grouped_pts = index_points(points, idx)
    cin_p = p["layers_p"][0][0].shape[0]
    feat = _concat_pad([grouped_xyz, grouped_pts], cin_p)          # bf16 [B,S,K,cin_p]
    pooled = fused_sa_mlp_max(feat.reshape(B * S, K, cin_p), p["layers_p"])
    return new_xyz, pooled[:, :p["out_dim"]].reshape(B, S, p["out_dim"])


def feature_propagation(xyz1, xyz2, points1, points2, p):
    B, N, _ = xyz1.shape
    S = xyz2.shape[1]
    if S == 1:
        interp = jnp.broadcast_to(points2, (B, N, points2.shape[-1]))
    else:
        d = square_distance(xyz1, xyz2)
        idx = jnp.argsort(d, axis=-1)[:, :, :3]
        d3 = jnp.take_along_axis(d, idx, axis=-1)
        w = 1.0 / (d3 + 1e-8)
        w = w / jnp.sum(w, axis=-1, keepdims=True)
        nb = index_points(points2, idx).astype(jnp.float32)
        interp = jnp.sum(nb * w[..., None], axis=2)
    cin_p = p["layers_p"][0][0].shape[0]
    feat = _concat_pad([points1, interp], cin_p)                   # bf16 [B,N,cin_p]
    out = fused_mlp(feat.reshape(B * N, cin_p), p["layers_p"])
    return out[:, :p["out_dim"]].reshape(B, N, p["out_dim"])


def pointnet2_forward(params, xyz_ncw, dataset_D):
    """xyz_ncw: [B, D+C, N] (PyTorch NCW).  Returns channels-last outputs."""
    B, _, N = xyz_ncw.shape
    x = jnp.transpose(xyz_ncw, (0, 2, 1))                          # [B,N,D+C]
    l0_xyz = x[:, :, :dataset_D]
    l0_points = x[:, :, dataset_D:]

    l1_xyz, l1_points = set_abstraction(l0_xyz, l0_points, params["sa1"])
    l2_xyz, l2_points = set_abstraction(l1_xyz, l1_points, params["sa2"])

    l1_points = feature_propagation(l1_xyz, l2_xyz, l1_points, l2_points, params["fp2"])
    l0_points = feature_propagation(l0_xyz, l1_xyz, l0_points, l1_points, params["fp1"])

    feat = l0_points.reshape(B * N, -1)                            # bf16 [B*N,16]
    sem, shift = fused_heads(feat, params["heads"])
    return sem.reshape(B, N, -1), shift.reshape(B, N, -1)


# ------------------------------- get_loss -----------------------------------

def get_loss(points, pred_sem_mat, pred_center_shift_vectors, label, num_class):
    """JAX/Pallas port of the PyTorch get_loss.forward.
    points: [B,N,D+C], pred_sem_mat: [B,N,K] (log-probs),
    pred_center_shift_vectors: [B,N,D+C], label: [B,2,N]."""
    B, N, _ = points.shape
    class_gt = label[:, 0, :].astype(jnp.int32)
    instance_gt = label[:, 1, :].astype(jnp.int32)

    # per-instance center (segment mean) -> gt shift vectors.  Data-dependent
    # scatter/gather, kept in plain JAX.
    def per_frame(pts, inst):
        sums = jax.ops.segment_sum(pts, inst, num_segments=N)
        cnt = jax.ops.segment_sum(jnp.ones((N,), jnp.float32), inst, num_segments=N)
        centers = sums / jnp.maximum(cnt, 1.0)[:, None]
        return centers[inst] - pts

    gt_shift = jax.vmap(per_frame)(points, instance_gt)            # [B,N,D+C]

    onehot = (class_gt[..., None] == jnp.arange(num_class)[None, None, :]
              ).astype(jnp.float32)                                # [B,N,K]

    # TODO(synk): on a training path, fuse these loss terms into the heads
    # kernel (pass labels + gt_shift) to skip the narrow-lane HBM round trip.
    nll_sum, st_sum = pallas_loss_sums(
        pred_sem_mat.reshape(B * N, -1).astype(jnp.float32),
        onehot.reshape(B * N, -1),
        gt_shift.reshape(B * N, -1),
        pred_center_shift_vectors.reshape(B * N, -1).astype(jnp.float32))

    # NOTE: mean of per-frame means == global mean because N is constant per
    # frame (matches the PyTorch loop over frames with F.nll_loss mean).
    sem_loss = nll_sum / (B * N)
    center_loss = st_sum / (B * N)
    return sem_loss + 0.2 * center_loss


# ------------------------- deterministic parameters -------------------------

def fold_bn(w, b, gamma, beta, mean, var, eps=1e-5):
    scale = gamma / jnp.sqrt(var + eps)
    return w * scale[None, :], (b - mean) * scale + beta


def pad_stack(raw_layers):
    """Pad a conv/bn stack: first cin to a multiple of 16, each cout to a
    multiple of 128 (lane-dense); inner cins follow the previous padded cout.
    Weights stored bf16, biases f32 [1, cout_p]."""
    padded = []
    prev_p = _rup(raw_layers[0][0].shape[0], 16)
    for w, b in raw_layers:
        cin, cout = w.shape
        coutp = _r128(cout)
        wp = jnp.zeros((prev_p, coutp), jnp.bfloat16).at[:cin, :cout].set(
            w.astype(jnp.bfloat16))
        bp = jnp.zeros((1, coutp), jnp.float32).at[0, :cout].set(b)
        padded.append((wp, bp))
        prev_p = coutp
    return padded


def init_conv_bn_stack(key, cin, mlp):
    layers = []
    last = cin
    for cout in mlp:
        key, k = jax.random.split(key)
        k1, k2, k3, k4, k5, k6 = jax.random.split(k, 6)
        w = jax.random.normal(k1, (last, cout), jnp.float32) / jnp.sqrt(last)
        b = 0.01 * jax.random.normal(k2, (cout,), jnp.float32)
        gamma = 1.0 + 0.1 * jax.random.normal(k3, (cout,), jnp.float32)
        beta = 0.1 * jax.random.normal(k4, (cout,), jnp.float32)
        mean = 0.1 * jax.random.normal(k5, (cout,), jnp.float32)
        var = 1.0 + 0.1 * jnp.abs(jax.random.normal(k6, (cout,), jnp.float32))
        layers.append(fold_bn(w, b, gamma, beta, mean, var))
        last = cout
    return layers, key


def init_plain_conv(key, cin, cout):
    key, k1, k2 = jax.random.split(key, 3)
    w = jax.random.normal(k1, (cin, cout), jnp.float32) / jnp.sqrt(cin)
    b = 0.01 * jax.random.normal(k2, (cout,), jnp.float32)
    return (w, b), key


def init_params(key, num_class, D, C, np1, r1, ns1, np2, r2, ns2):
    assert num_class <= 128, "class-lane mask in the heads kernel assumes <=128"
    params = {}
    # standard pointnet2_sem_seg SA widths (decoupled from nsample).
    sa1_raw, key = init_conv_bn_stack(key, C + D, [32, 32, 64])
    params["sa1"] = dict(npoint=np1, radius=r1, nsample=ns1,
                         layers_p=pad_stack(sa1_raw), out_dim=64)
    sa2_raw, key = init_conv_bn_stack(key, 64 + D, [64, 128, 256])
    params["sa2"] = dict(npoint=np2, radius=r2, nsample=ns2,
                         layers_p=pad_stack(sa2_raw), out_dim=256)
    fp2_raw, key = init_conv_bn_stack(key, 256 + 64, [64, 32])
    params["fp2"] = dict(layers_p=pad_stack(fp2_raw), out_dim=32)
    fp1_raw, key = init_conv_bn_stack(key, 32 + C, [32, 32, 16])
    params["fp1"] = dict(layers_p=pad_stack(fp1_raw), out_dim=16)

    h1a, key = init_conv_bn_stack(key, 16, [16])            # conv11 + bn1
    (w12, b12), key = init_plain_conv(key, 16, num_class)   # conv12
    h2a, key = init_conv_bn_stack(key, 16, [16])            # conv21 + bn2
    (w22, b22), key = init_plain_conv(key, 16, D + C)       # conv22

    (w11p, b11p), = pad_stack(h1a)
    (w21p, b21p), = pad_stack(h2a)
    kp = w11p.shape[1]                                       # 128
    # block-diagonal second-layer weight: both heads in one 256x256 MXU pass
    w2cat = jnp.zeros((2 * kp, 2 * kp), jnp.bfloat16)
    w2cat = w2cat.at[:w12.shape[0], :num_class].set(w12.astype(jnp.bfloat16))
    w2cat = w2cat.at[kp:kp + w22.shape[0], kp:kp + (D + C)].set(w22.astype(jnp.bfloat16))
    b2cat = jnp.zeros((1, 2 * kp), jnp.float32)
    b2cat = b2cat.at[0, :num_class].set(b12).at[0, kp:kp + (D + C)].set(b22)

    params["heads"] = dict(
        w1cat=jnp.concatenate([w11p, w21p], axis=1),         # both first layers: 16 -> 256
        b1cat=jnp.concatenate([b11p, b21p], axis=1),
        w2cat=w2cat, b2cat=b2cat,
        num_class=num_class, shift_dim=D + C)
    return params


# ----------------------------------- main ------------------------------------

if __name__ == "__main__":
    B, N = 2, 32                 # batch, number of points
    D, C = 3, 2                  # dataset_D (coords), dataset_C (extra features)
    num_class = 5
    np1, r1, ns1 = 16, 0.4, 8    # sa1: npoint, radius, nsample
    np2, r2, ns2 = 4, 0.8, 8     # sa2: npoint, radius, nsample

    key = jax.random.PRNGKey(0)
    kx, kparam, kc, ki = jax.random.split(key, 4)
    xyz = jax.random.normal(kx, (B, D + C, N), jnp.float32)   # PyTorch NCW input
    params = init_params(kparam, num_class, D, C, np1, r1, ns1, np2, r2, ns2)

    # deterministic labels: [B, 2, N] with row 0 = class id, row 1 = instance id
    class_ids = jax.random.randint(kc, (B, N), 0, num_class)
    inst_ids = jax.random.randint(ki, (B, N), 0, 4)
    label = jnp.stack([class_ids, inst_ids], axis=1).astype(jnp.float32)

    pred_sem_mat, pred_center_shift = pointnet2_forward(params, xyz, dataset_D=D)
    jax.block_until_ready((pred_sem_mat, pred_center_shift))

    assert pred_sem_mat.shape == (B, N, num_class)
    assert pred_center_shift.shape == (B, N, D + C)
    assert bool(jnp.all(jnp.isfinite(pred_sem_mat)))
    assert bool(jnp.all(jnp.isfinite(pred_center_shift)))
    # log_softmax rows must sum to ~1 in probability space
    assert jnp.allclose(jnp.sum(jnp.exp(pred_sem_mat), axis=-1), 1.0, atol=1e-4)

    # get_loss (the spec module): total = nll sem loss + 0.2 * center-shift loss
    points_cl = jnp.transpose(xyz, (0, 2, 1))                 # [B, N, D+C]
    total_loss = get_loss(points_cl, pred_sem_mat, pred_center_shift, label, num_class)
    jax.block_until_ready(total_loss)
    assert total_loss.shape == ()
    assert bool(jnp.isfinite(total_loss))
    assert float(total_loss) >= 0.0

    print("KERNEL_OK")
</pallas_src>

<mosaic_0001>
module attributes {stable_mosaic.version = 11 : i64} {
  func.func @_sa_stack_kernel(%arg0: i32, %arg1: memref<32x8x16xbf16, #tpu.memory_space<vmem>>, %arg2: memref<16x128xbf16, #tpu.memory_space<vmem>>, %arg3: memref<1x128xf32, #tpu.memory_space<vmem>>, %arg4: memref<128x128xbf16, #tpu.memory_space<vmem>>, %arg5: memref<1x128xf32, #tpu.memory_space<vmem>>, %arg6: memref<128x128xbf16, #tpu.memory_space<vmem>>, %arg7: memref<1x128xf32, #tpu.memory_space<vmem>>, %arg8: memref<32x128xbf16, #tpu.memory_space<vmem>>) attributes {dimension_semantics = [#tpu.dimension_semantics<parallel>], iteration_bounds = array<i64: 1>, scalar_prefetch = 0 : i64, scratch_operands = 0 : i64, tpu.core_type = #tpu.core_type<tc>, window_params = [{transform_indices = @transform_0, window_bounds = array<i64: 32, 8, 16>}, {pipeline_mode = #tpu.pipeline_mode<synchronous>, transform_indices = @transform_1, window_bounds = array<i64: 16, 128>}, {pipeline_mode = #tpu.pipeline_mode<synchronous>, transform_indices = @transform_2, window_bounds = array<i64: 1, 128>}, {pipeline_mode = #tpu.pipeline_mode<synchronous>, transform_indices = @transform_3, window_bounds = array<i64: 128, 128>}, {pipeline_mode = #tpu.pipeline_mode<synchronous>, transform_indices = @transform_4, window_bounds = array<i64: 1, 128>}, {pipeline_mode = #tpu.pipeline_mode<synchronous>, transform_indices = @transform_5, window_bounds = array<i64: 128, 128>}, {pipeline_mode = #tpu.pipeline_mode<synchronous>, transform_indices = @transform_6, window_bounds = array<i64: 1, 128>}, {transform_indices = @transform_7, window_bounds = array<i64: 32, 128>}]} {
    %c0 = arith.constant 0 : index
    %c0_0 = arith.constant 0 : index
    %c0_1 = arith.constant 0 : index
    %0 = vector.load %arg1[%c0, %c0_0, %c0_1] : memref<32x8x16xbf16, #tpu.memory_space<vmem>>, vector<32x8x16xbf16>
    %1 = vector.shape_cast %0 : vector<32x8x16xbf16> to vector<256x16xbf16>
    %c0_2 = arith.constant 0 : index
    %c0_3 = arith.constant 0 : index
    %2 = vector.load %arg2[%c0_2, %c0_3] : memref<16x128xbf16, #tpu.memory_space<vmem>>, vector<16x128xbf16>
    %c0_4 = arith.constant 0 : index
    %c0_5 = arith.constant 0 : index
    %3 = vector.load %arg3[%c0_4, %c0_5] : memref<1x128xf32, #tpu.memory_space<vmem>>, vector<1x128xf32>
    %cst = arith.constant dense<0.000000e+00> : vector<256x128xf32>
    %4 = tpu.matmul %1, %2, %cst {dimension_numbers = #tpu.dot_dimension_numbers<[1], [0], [0], [1], [0, 0, 1, 1], [], []>} : vector<256x16xbf16>, vector<16x128xbf16>, vector<256x128xf32> -> vector<256x128xf32>
    %5 = vector.broadcast %3 : vector<1x128xf32> to vector<256x128xf32>
    %6 = arith.addf %4, %5 : vector<256x128xf32>
    %cst_6 = arith.constant 0.000000e+00 : f32
    %7 = vector.broadcast %cst_6 : f32 to vector<256x128xf32>
    %8 = arith.maximumf %6, %7 : vector<256x128xf32>
    %9 = arith.truncf %8 : vector<256x128xf32> to vector<256x128xbf16>
    %c0_7 = arith.constant 0 : index
    %c0_8 = arith.constant 0 : index
    %10 = vector.load %arg4[%c0_7, %c0_8] : memref<128x128xbf16, #tpu.memory_space<vmem>>, vector<128x128xbf16>
    %c0_9 = arith.constant 0 : index
    %c0_10 = arith.constant 0 : index
    %11 = vector.load %arg5[%c0_9, %c0_10] : memref<1x128xf32, #tpu.memory_space<vmem>>, vector<1x128xf32>
    %cst_11 = arith.constant dense<0.000000e+00> : vector<256x128xf32>
    %12 = tpu.matmul %9, %10, %cst_11 {dimension_numbers = #tpu.dot_dimension_numbers<[1], [0], [0], [1], [0, 0, 1, 1], [], []>} : vector<256x128xbf16>, vector<128x128xbf16>, vector<256x128xf32> -> vector<256x128xf32>
    %13 = vector.broadcast %11 : vector<1x128xf32> to vector<256x128xf32>
    %14 = arith.addf %12, %13 : vector<256x128xf32>
    %cst_12 = arith.constant 0.000000e+00 : f32
    %15 = vector.broadcast %cst_12 : f32 to vector<256x128xf32>
    %16 = arith.maximumf %14, %15 : vector<256x128xf32>
    %17 = arith.truncf %16 : vector<256x128xf32> to vector<256x128xbf16>
    %c0_13 = arith.constant 0 : index
    %c0_14 = arith.constant 0 : index
    %18 = vector.load %arg6[%c0_13, %c0_14] : memref<128x128xbf16, #tpu.memory_space<vmem>>, vector<128x128xbf16>
    %c0_15 = arith.constant 0 : index
    %c0_16 = arith.constant 0 : index
    %19 = vector.load %arg7[%c0_15, %c0_16] : memref<1x128xf32, #tpu.memory_space<vmem>>, vector<1x128xf32>
    %cst_17 = arith.constant dense<0.000000e+00> : vector<256x128xf32>
    %20 = tpu.matmul %17, %18, %cst_17 {dimension_numbers = #tpu.dot_dimension_numbers<[1], [0], [0], [1], [0, 0, 1, 1], [], []>} : vector<256x128xbf16>, vector<128x128xbf16>, vector<256x128xf32> -> vector<256x128xf32>
    %21 = vector.broadcast %19 : vector<1x128xf32> to vector<256x128xf32>
    %22 = arith.addf %20, %21 : vector<256x128xf32>
    %cst_18 = arith.constant 0.000000e+00 : f32
    %23 = vector.broadcast %cst_18 : f32 to vector<256x128xf32>
    %24 = arith.maximumf %22, %23 : vector<256x128xf32>
    %25 = vector.shape_cast %24 : vector<256x128xf32> to vector<32x8x128xf32>
    %cst_19 = arith.constant dense<0xFF800000> : vector<32x128xf32>
    %26 = vector.multi_reduction <maximumf>, %25, %cst_19 [1] : vector<32x8x128xf32> to vector<32x128xf32>
    %27 = arith.truncf %26 : vector<32x128xf32> to vector<32x128xbf16>
    %c0_20 = arith.constant 0 : index
    %c0_21 = arith.constant 0 : index
    %28 = vector.load %arg8[%c0_20, %c0_21] : memref<32x128xbf16, #tpu.memory_space<vmem>>, vector<32x128xbf16>
    tpu.vector_store %arg8[%c0_20, %c0_21], %27 {strides = array<i32>} : memref<32x128xbf16, #tpu.memory_space<vmem>>, vector<32x128xbf16>,
    return
  }
  func.func @transform_0(%arg0: i32) -> (i32, i32, i32) {
    %c0_i32 = arith.constant 0 : i32
    %c0_i32_0 = arith.constant 0 : i32
    %c0_i32_1 = arith.constant 0 : i32
    return %arg0, %c0_i32, %c0_i32_0 : i32, i32, i32
  }
  func.func @transform_1(%arg0: i32) -> (i32, i32) {
    %c0_i32 = arith.constant 0 : i32
    %c0_i32_0 = arith.constant 0 : i32
    %c0_i32_1 = arith.constant 0 : i32
    return %c0_i32, %c0_i32_0 : i32, i32
  }
  func.func @transform_2(%arg0: i32) -> (i32, i32) {
    %c0_i32 = arith.constant 0 : i32
    %c0_i32_0 = arith.constant 0 : i32
    %c0_i32_1 = arith.constant 0 : i32
    return %c0_i32, %c0_i32_0 : i32, i32
  }
  func.func @transform_3(%arg0: i32) -> (i32, i32) {
    %c0_i32 = arith.constant 0 : i32
    %c0_i32_0 = arith.constant 0 : i32
    %c0_i32_1 = arith.constant 0 : i32
    return %c0_i32, %c0_i32_0 : i32, i32
  }
  func.func @transform_4(%arg0: i32) -> (i32, i32) {
    %c0_i32 = arith.constant 0 : i32
    %c0_i32_0 = arith.constant 0 : i32
    %c0_i32_1 = arith.constant 0 : i32
    return %c0_i32, %c0_i32_0 : i32, i32
  }
  func.func @transform_5(%arg0: i32) -> (i32, i32) {
    %c0_i32 = arith.constant 0 : i32
    %c0_i32_0 = arith.constant 0 : i32
    %c0_i32_1 = arith.constant 0 : i32
    return %c0_i32, %c0_i32_0 : i32, i32
  }
  func.func @transform_6(%arg0: i32) -> (i32, i32) {
    %c0_i32 = arith.constant 0 : i32
    %c0_i32_0 = arith.constant 0 : i32
    %c0_i32_1 = arith.constant 0 : i32
    return %c0_i32, %c0_i32_0 : i32, i32
  }
  func.func @transform_7(%arg0: i32) -> (i32, i32) {
    %c0_i32 = arith.constant 0 : i32
    %c0_i32_0 = arith.constant 0 : i32
    return %arg0, %c0_i32 : i32, i32
  }
}

</mosaic_0001>

<bundles_post_ra>
// kernel: tpu_custom_call.1
= control target key start
LH: loop header
LB: loop body
LE: loop exit
PB: predicated region body
PF: predicated region fallthrough
CT: control target
= control target key end

     0   :  { %vm155_vm0 = vcmask 130048   ;;  %s2108_s0 = inlined_call_operand.vmem [shape: bf16[32,8,16], index: 0, kind: input, shape index: {}]   ;;  %s2109_s1 = inlined_call_operand.vmem [shape: bf16[16,128], index: 1, kind: input, shape index: {}]   ;;  %s2110_s2 = inlined_call_operand.vmem [shape: f32[1,128], index: 2, kind: input, shape index: {}]   ;;  %s2111_s3 = inlined_call_operand.vmem [shape: bf16[128,128], index: 3, kind: input, shape index: {}]   ;;  %s2112_s4 = inlined_call_operand.vmem [shape: f32[1,128], index: 4, kind: input, shape index: {}]   ;;  %s2113_s5 = inlined_call_operand.vmem [shape: bf16[128,128], index: 5, kind: input, shape index: {}]   ;;  %s2114_s6 = inlined_call_operand.vmem [shape: f32[1,128], index: 6, kind: input, shape index: {}]   ;;  %s2115_s7 = inlined_call_operand.hbm [shape: bf16[32,128], index: 7, kind: output, shape index: {}]  }
   0x1   :  { %v1688_v0 = vld [vmem:[%s2109_s1] sm:$0xff]   ;;  %v1690_v2 = vld [vmem:[%s2108_s0 + $0x8] sm:$0xff]   ;;  %v1691_v3 = vld [vmem:[%s2108_s0 + $0x10] sm:$0xff]  }
   0x2   :  { %v1689_v1 = vld [vmem:[%s2108_s0] sm:$0xff]   ;;  %1553 = vmatprep.subr.bf16.mxu0 %v1688_v0  ;;  %1683 = vmatprep.subr.bf16.mxu1 %v1688_v0  ;;  %v1692_v4 = vld [vmem:[%s2108_s0 + $0x18] sm:$0xff]   ;;  %v1698_v7 = vld [vmem:[%s2108_s0 + $0x48] sm:$0xff]  }
   0x3   :  { %1554 = vmatpush3.bf16.msra.mxu0 %v1688_v0  ;;  %1555 = vmatprep.mubr.msk.bf16.mxu0 %vm155_vm0, %v1689_v1  ;;  %v1693_v5 = vld [vmem:[%s2108_s0 + $0x20] sm:$0xff]   ;;  %v1699_v8 = vld [vmem:[%s2108_s0 + $0x50] sm:$0xff]   ;;  %v1700_v9 = vld [vmem:[%s2108_s0 + $0x58] sm:$0xff]  }
   0x4   :  { %1684 = vmatpush3.bf16.msra.mxu1 %v1688_v0  ;;  %v1697_v6 = vld [vmem:[%s2108_s0 + $0x40] sm:$0xff]   ;;  %v1694_v10 = vld [vmem:[%s2108_s0 + $0x28] sm:$0xff]   ;;  %v1695_v14 = vld [vmem:[%s2108_s0 + $0x30] sm:$0xff]  }
   0x5   :  { %1571 = vmatprep.mubr.msk.bf16.mxu1 %vm155_vm0, %v1697_v6  ;;  %v1701_v11 = vld [vmem:[%s2108_s0 + $0x60] sm:$0xff]   ;;  %v1706_v13 = vld [vmem:[%s2111_s3 + $0x8] sm:$0xff]   ;;  %v1707_v16 = vld [vmem:[%s2111_s3 + $0x10] sm:$0xff]  }
   0x6   :  { %1556 = vmatmul.mubr.msk.bf16.vlgmr.msra.gmra.mrb[0].mxu0 %vm155_vm0, %v1690_v2  ;;  %v1705_v12 = vld [vmem:[%s2111_s3] sm:$0xff]   ;;  %v1702_v15 = vld [vmem:[%s2108_s0 + $0x68] sm:$0xff]   ;;  %v1703_v17 = vld [vmem:[%s2108_s0 + $0x70] sm:$0xff]  }
   0x7   :  { %1559 = vmatprep.mubr.msk.bf16.mxu0 %vm155_vm0, %v1691_v3  ;;  %1572 = vmatmul.mubr.msk.bf16.vlgmr.msra.gmra.mrb[0].mxu1 %vm155_vm0, %v1698_v7  ;;  %v1696_v18 = vld [vmem:[%s2108_s0 + $0x38] sm:$0xff]  }
   0x8   :  { %1575 = vmatprep.mubr.msk.bf16.mxu1 %vm155_vm0, %v1699_v8  ;;  %1587 = vmatprep.subr.bf16.mxu1 %v1705_v12  ;;  %v1708_v19 = vld [vmem:[%s2111_s3 + $0x18] sm:$0xff]  }
   0x9   :  { %1588 = vmatpush3.bf16.msra.mxu1 %v1705_v12 }
   0xa   :  { %1589 = vmatprep.subr.bf16.mxu1 %v1706_v13 }
   0xd   :  { %1590 = vmatpush3.bf16.msra.mxu1 %v1706_v13 }
   0xe   :  { %1560 = vmatmul.mubr.msk.bf16.gmra.mrb[4].mxu0 %vm155_vm0, %v1692_v4  ;;  %1591 = vmatprep.subr.bf16.mxu1 %v1707_v16 }
   0xf   :  { %1563 = vmatprep.mubr.msk.bf16.mxu0 %vm155_vm0, %v1693_v5  ;;  %1576 = vmatmul.mubr.msk.bf16.gmra.mrb[4].mxu1 %vm155_vm0, %v1700_v9 }
  0x10   :  { %1579 = vmatprep.mubr.msk.bf16.mxu1 %vm155_vm0, %v1701_v11 }
  0x11   :  { %1592 = vmatpush3.bf16.msra.mxu1 %v1707_v16 }
  0x16   :  { %1564 = vmatmul.mubr.msk.bf16.gmra.mrb[8].mxu0 %vm155_vm0, %v1694_v10 }
  0x17   :  { %1567 = vmatprep.mubr.msk.bf16.mxu0 %vm155_vm0, %v1695_v14  ;;  %1580 = vmatmul.mubr.msk.bf16.gmra.mrb[8].mxu1 %vm155_vm0, %v1702_v15 }
  0x18   :  { %1583 = vmatprep.mubr.msk.bf16.mxu1 %vm155_vm0, %v1703_v17 }
  0x19   :  { %12 = vsyncpa [#allocation3], 0  ;;  %1593 = vmatprep.subr.bf16.mxu1 %v1708_v19  ;;  %v1709_v20 = vld [vmem:[%s2111_s3 + $0x20] sm:$0xff]   ;;  %v1704_v21 = vld [vmem:[%s2108_s0 + $0x78] sm:$0xff]   ;;  %vm1309_vm1 = vcmask 1041409   ;;  %vm1311_vm2 = vcmask 1042434  }
  0x1a   :  { %1594 = vmatpush3.bf16.msra.mxu1 %v1708_v19  ;;  %v1710_v22 = vld [vmem:[%s2111_s3 + $0x28] sm:$0xff]   ;;  %v1711_v23 = vld [vmem:[%s2111_s3 + $0x30] sm:$0xff]   ;;  %v1712_v24 = vld [vmem:[%s2111_s3 + $0x38] sm:$0xff]   ;;  %vm1313_vm3 = vcmask 1043459   ;;  %vm1315_vm4 = vcmask 1044484   ;;  %vm1317_vm5 = vcmask 1045509  }
  0x1b   :  { %1595 = vmatprep.subr.bf16.mxu1 %v1709_v20  ;;  %v1713_v25 = vld [vmem:[%s2113_s5] sm:$0xff]   ;;  %v1714_v26 = vld [vmem:[%s2113_s5 + $0x8] sm:$0xff]   ;;  %v1715_v27 = vld [vmem:[%s2113_s5 + $0x10] sm:$0xff]   ;;  %vm1319_vm6 = vcmask 1046534   ;;  %vm1321_vm7 = vcmask 1047559  }
  0x1c   :  { %1635 = vmatprep.subr.bf16.mxu0 %v1713_v25  ;;  %v1716_v28 = vld [vmem:[%s2113_s5 + $0x18] sm:$0xff]   ;;  %v1717_v29 = vld [vmem:[%s2113_s5 + $0x20] sm:$0xff]   ;;  %v1718_v30 = vld [vmem:[%s2113_s5 + $0x28] sm:$0xff]  }
  0x1d   :  { %1636 = vmatpush3.bf16.msra.mxu0 %v1713_v25  ;;  %v1900_v31 = vld [vmem:[%s2110_s2] ss:$0 sm:$0xff] }
  0x1e   :  { %1568 = vmatmul.mubr.msk.bf16.gmra.mrb[12].mxu0 %vm155_vm0, %v1696_v18  ;;  %1596 = vmatpush3.bf16.msra.mxu1 %v1709_v20 }
  0x1f   :  { %1584 = vmatmul.mubr.msk.bf16.gmra.mrb[12].mxu1 %vm155_vm0, %v1704_v21  ;;  %1597 = vmatprep.subr.bf16.mxu1 %v1710_v22 }
  0x20   :  { %1637 = vmatprep.subr.bf16.mxu0 %v1714_v26 }
  0x21   :  { %1638 = vmatpush3.bf16.msra.mxu0 %v1714_v26 }
  0x22   :  { %1598 = vmatpush3.bf16.msra.mxu1 %v1710_v22  ;;  %1639 = vmatprep.subr.bf16.mxu0 %v1715_v27 }
  0x23   :  { %1599 = vmatprep.subr.bf16.mxu1 %v1711_v23 }
  0x25   :  { %1640 = vmatpush3.bf16.msra.mxu0 %v1715_v27 }
  0x26   :  { %1600 = vmatpush3.bf16.msra.mxu1 %v1711_v23  ;;  %1641 = vmatprep.subr.bf16.mxu0 %v1716_v28 }
  0x27   :  { %1601 = vmatprep.subr.bf16.mxu1 %v1712_v24 }
  0x29   :  { %1642 = vmatpush3.bf16.msra.mxu0 %v1716_v28 }
  0x2a   :  { %1602 = vmatpush3.bf16.msra.mxu1 %v1712_v24  ;;  %1643 = vmatprep.subr.bf16.mxu0 %v1717_v29 }
  0x2d   :  { %1644 = vmatpush3.bf16.msra.mxu0 %v1717_v29 }
  0x2e   :  { %1645 = vmatprep.subr.bf16.mxu0 %v1718_v30 }
  0x31   :  { %1646 = vmatpush3.bf16.msra.mxu0 %v1718_v30 }
  0xd9   :  { %v1557_v32 = vpop.f32.mrb[0].mxu0 }
  0xda   :  { %v247_v33 = vadd.f32 %v1557_v32, %v1900_v31  ;;  %v238_v34 = vpop.f32.mrb[1].mxu0  ;;  %v1573_v44 = vpop.f32.mrb[0].mxu1 }
  0xdb   :  { %v239_v35 = vadd.f32 %v1900_v31, %v238_v34  ;;  %v1558_v36 = vpop.f32.mrb[2].mxu0  ;;  %v311_v46 = vadd.f32 %v1573_v44, %v1900_v31  ;;  %v302_v47 = vpop.f32.mrb[1].mxu1 }
  0xdc   :  { %v250_v37 = vadd.f32 %v1558_v36, %v1900_v31  ;;  %v241_v38 = vpop.f32.mrb[3].mxu0  ;;  %v367_v40 = vmax.f32 %v247_v33, 0.0  ;;  %v303_v50 = vadd.f32 %v1900_v31, %v302_v47  ;;  %v1574_v51 = vpop.f32.mrb[2].mxu1 }
  0xdd   :  { %v242_v39 = vadd.f32 %v1900_v31, %v241_v38  ;;  %v365_v42 = vmax.f32 %v239_v35, 0.0  ;;  %v383_v54 = vmax.f32 %v311_v46, 0.0  ;;  %v314_v55 = vadd.f32 %v1574_v51, %v1900_v31  ;;  %v305_v56 = vpop.f32.mrb[3].mxu1 }
  0xde   :  { %v368_v41 = vmax.f32 %v250_v37, 0.0  ;;  %v381_v59 = vmax.f32 %v303_v50, 0.0  ;;  %v306_v60 = vadd.f32 %v1900_v31, %v305_v56 }
  0xdf   :  { %v366_v43 = vmax.f32 %v242_v39, 0.0  ;;  %v384_v63 = vmax.f32 %v314_v55, 0.0 }
  0xe0   :  { %v398_v45 = vpack.c.bf16 %v368_v41, %v367_v40  ;;  %v382_v1 = vmax.f32 %v306_v60, 0.0 }
  0xe1   :  { %v397_v48 = vpack.c.bf16 %v366_v43, %v365_v42  ;;  %v1561_v49 = vpop.f32.mrb[4].mxu0  ;;  %v1914_v4 = vpack.c.bf16 %v384_v63, %v383_v54 }
  0xe2   :  { %v263_v52 = vadd.f32 %v1561_v49, %v1900_v31  ;;  %v254_v53 = vpop.f32.mrb[5].mxu0  ;;  %v1916_v7 = vpack.c.bf16 %v382_v1, %v381_v59  ;;  %v1577_v8 = vpop.f32.mrb[4].mxu1 }
  0xe3   :  { %v255_v57 = vadd.f32 %v1900_v31, %v254_v53  ;;  %v1562_v58 = vpop.f32.mrb[6].mxu0  ;;  %1603 = vmatprep.mubr.bf16.mxu1 %v397_v48  ;;  %v327_v10 = vadd.f32 %v1577_v8, %v1900_v31  ;;  %v318_v11 = vpop.f32.mrb[5].mxu1 }
  0xe4   :  { %v266_v61 = vadd.f32 %v1562_v58, %v1900_v31  ;;  %v257_v62 = vpop.f32.mrb[7].mxu0  ;;  %1604 = vmatmul.mubr.bf16.vlgmr.msra.gmra.mrb[16].mxu1 %v398_v45  ;;  %v371_v2 = vmax.f32 %v263_v52, 0.0  ;;  %v319_v14 = vadd.f32 %v1900_v31, %v318_v11  ;;  %v1578_v15 = vpop.f32.mrb[6].mxu1 }
  0xe5   :  { %v258_v0 = vadd.f32 %v1900_v31, %v257_v62  ;;  %v369_v5 = vmax.f32 %v255_v57, 0.0  ;;  %v387_v18 = vmax.f32 %v327_v10, 0.0  ;;  %v330_v19 = vadd.f32 %v1578_v15, %v1900_v31  ;;  %v321_v20 = vpop.f32.mrb[7].mxu1 }
  0xe6   :  { %v372_v3 = vmax.f32 %v266_v61, 0.0  ;;  %v385_v23 = vmax.f32 %v319_v14, 0.0  ;;  %v322_v24 = vadd.f32 %v1900_v31, %v321_v20 }
  0xe7   :  { %v370_v6 = vmax.f32 %v258_v0, 0.0  ;;  %v388_v27 = vmax.f32 %v330_v19, 0.0  ;;  %v1719_v19 = vld [vmem:[%s2113_s5 + $0x30] sm:$0xff]  }
  0xe8   :  { %v400_v9 = vpack.c.bf16 %v372_v3, %v371_v2  ;;  %v386_v29 = vmax.f32 %v322_v24, 0.0  ;;  %1647 = vmatprep.subr.bf16.mxu0 %v1719_v19 }
  0xe9   :  { %v399_v12 = vpack.c.bf16 %v370_v6, %v369_v5  ;;  %v1565_v13 = vpop.f32.mrb[8].mxu0  ;;  %v408_v33 = vpack.c.bf16 %v388_v27, %v387_v18  ;;  %1648 = vmatpush3.bf16.msra.mxu0 %v1719_v19 }
  0xea   :  { %v279_v16 = vadd.f32 %v1565_v13, %v1900_v31  ;;  %v270_v17 = vpop.f32.mrb[9].mxu0  ;;  %v407_v36 = vpack.c.bf16 %v386_v29, %v385_v23  ;;  %v1581_v37 = vpop.f32.mrb[8].mxu1 }
  0xeb   :  { %v271_v21 = vadd.f32 %v1900_v31, %v270_v17  ;;  %v1566_v22 = vpop.f32.mrb[10].mxu0  ;;  %1607 = vmatprep.mubr.bf16.mxu1 %v399_v12  ;;  %v343_v39 = vadd.f32 %v1581_v37, %v1900_v31  ;;  %v334_v40 = vpop.f32.mrb[9].mxu1 }
  0xec   :  { %v282_v25 = vadd.f32 %v1566_v22, %v1900_v31  ;;  %v273_v26 = vpop.f32.mrb[11].mxu0  ;;  %1608 = vmatmul.mubr.bf16.gmra.mrb[20].mxu1 %v400_v9  ;;  %v375_v30 = vmax.f32 %v279_v16, 0.0  ;;  %v335_v43 = vadd.f32 %v1900_v31, %v334_v40  ;;  %v1582_v44 = vpop.f32.mrb[10].mxu1 }
  0xed   :  { %v274_v28 = vadd.f32 %v1900_v31, %v273_v26  ;;  %v373_v34 = vmax.f32 %v271_v21, 0.0  ;;  %v391_v47 = vmax.f32 %v343_v39, 0.0  ;;  %v346_v48 = vadd.f32 %v1582_v44, %v1900_v31  ;;  %v337_v49 = vpop.f32.mrb[11].mxu1 }
  0xee   :  { %v376_v32 = vmax.f32 %v282_v25, 0.0  ;;  %v389_v52 = vmax.f32 %v335_v43, 0.0  ;;  %v338_v53 = vadd.f32 %v1900_v31, %v337_v49 }
  0xef   :  { %v374_v35 = vmax.f32 %v274_v28, 0.0  ;;  %v392_v56 = vmax.f32 %v346_v48, 0.0 }
  0xf0   :  { %v402_v38 = vpack.c.bf16 %v376_v32, %v375_v30  ;;  %v390_v58 = vmax.f32 %v338_v53, 0.0 }
  0xf1   :  { %v401_v41 = vpack.c.bf16 %v374_v35, %v373_v34  ;;  %v1569_v42 = vpop.f32.mrb[12].mxu0  ;;  %v410_v61 = vpack.c.bf16 %v392_v56, %v391_v47 }
  0xf2   :  { %v295_v45 = vadd.f32 %v1569_v42, %v1900_v31  ;;  %v286_v46 = vpop.f32.mrb[13].mxu0  ;;  %v409_v0 = vpack.c.bf16 %v390_v58, %v389_v52  ;;  %v1585_v1 = vpop.f32.mrb[12].mxu1 }
  0xf3   :  { %v287_v50 = vadd.f32 %v1900_v31, %v286_v46  ;;  %v1570_v51 = vpop.f32.mrb[14].mxu0  ;;  %1611 = vmatprep.mubr.bf16.mxu1 %v401_v41  ;;  %v359_v3 = vadd.f32 %v1585_v1, %v1900_v31  ;;  %v350_v5 = vpop.f32.mrb[13].mxu1 }
  0xf4   :  { %v298_v54 = vadd.f32 %v1570_v51, %v1900_v31  ;;  %v289_v55 = vpop.f32.mrb[15].mxu0  ;;  %1612 = vmatmul.mubr.bf16.gmra.mrb[24].mxu1 %v402_v38  ;;  %v379_v59 = vmax.f32 %v295_v45, 0.0  ;;  %v351_v8 = vadd.f32 %v1900_v31, %v350_v5  ;;  %v1586_v9 = vpop.f32.mrb[14].mxu1 }
  0xf5   :  { %v290_v57 = vadd.f32 %v1900_v31, %v289_v55  ;;  %v377_v62 = vmax.f32 %v287_v50, 0.0  ;;  %v395_v10 = vmax.f32 %v359_v3, 0.0  ;;  %v362_v11 = vadd.f32 %v1586_v9, %v1900_v31  ;;  %v353_v12 = vpop.f32.mrb[15].mxu1 }
  0xf6   :  { %v380_v60 = vmax.f32 %v298_v54, 0.0  ;;  %v393_v13 = vmax.f32 %v351_v8, 0.0  ;;  %v354_v14 = vadd.f32 %v1900_v31, %v353_v12  ;;  %v1720_v31 = vld [vmem:[%s2113_s5 + $0x38] sm:$0xff]  }
  0xf7   :  { %v378_v63 = vmax.f32 %v290_v57, 0.0  ;;  %v396_v15 = vmax.f32 %v362_v11, 0.0  ;;  %1649 = vmatprep.subr.bf16.mxu0 %v1720_v31 }
  0xf8   :  { %v404_v2 = vpack.c.bf16 %v380_v60, %v379_v59  ;;  %v394_v16 = vmax.f32 %v354_v14, 0.0  ;;  %1650 = vmatpush3.bf16.msra.mxu0 %v1720_v31 }
  0xf9   :  { %v403_v6 = vpack.c.bf16 %v378_v63, %v377_v62  ;;  %v412_v17 = vpack.c.bf16 %v396_v15, %v395_v10 }
  0xfa   :  { %v411_v18 = vpack.c.bf16 %v394_v16, %v393_v13 }
  0xfb   :  { %1615 = vmatprep.mubr.bf16.mxu1 %v403_v6 }
  0xfc   :  { %1616 = vmatmul.mubr.bf16.gmra.mrb[28].mxu1 %v404_v2 }
  0xfd   :  { %1619 = vmatprep.mubr.bf16.mxu1 %v1916_v7 }
 0x104   :  { %1620 = vmatmul.mubr.bf16.gmra.mrb[32].mxu1 %v1914_v4  ;;  %v1949_v4 = vld [vmem:[%s2112_s4] ss:$0 sm:$0xff] }
 0x105   :  { %1623 = vmatprep.mubr.bf16.mxu1 %v407_v36 }
 0x10c   :  { %1624 = vmatmul.mubr.bf16.gmra.mrb[36].mxu1 %v408_v33 }
 0x10d   :  { %1627 = vmatprep.mubr.bf16.mxu1 %v409_v0 }
 0x114   :  { %1628 = vmatmul.mubr.bf16.gmra.mrb[40].mxu1 %v410_v61 }
 0x115   :  { %1631 = vmatprep.mubr.bf16.mxu1 %v411_v18 }
 0x11c   :  { %1632 = vmatmul.mubr.bf16.gmra.mrb[44].mxu1 %v412_v17 }
 0x1b7   :  { %v1605_v7 = vpop.f32.mrb[16].mxu1 }
 0x1b8   :  { %v527_v20 = vadd.f32 %v1605_v7, %v1949_v4  ;;  %v518_v21 = vpop.f32.mrb[17].mxu1 }
 0x1b9   :  { %v519_v22 = vadd.f32 %v1949_v4, %v518_v21  ;;  %v1606_v23 = vpop.f32.mrb[18].mxu1 }
 0x1ba   :  { %v530_v24 = vadd.f32 %v1606_v23, %v1949_v4  ;;  %v521_v25 = vpop.f32.mrb[19].mxu1  ;;  %v647_v27 = vmax.f32 %v527_v20, 0.0 }
 0x1bb   :  { %v522_v26 = vadd.f32 %v1949_v4, %v521_v25  ;;  %v645_v29 = vmax.f32 %v519_v22, 0.0 }
 0x1bc   :  { %v648_v28 = vmax.f32 %v530_v24, 0.0 }
 0x1bd   :  { %v646_v30 = vmax.f32 %v522_v26, 0.0 }
 0x1be   :  { %v678_v32 = vpack.c.bf16 %v648_v28, %v647_v27 }
 0x1bf   :  { %v677_v33 = vpack.c.bf16 %v646_v30, %v645_v29  ;;  %v1609_v34 = vpop.f32.mrb[20].mxu1 }
 0x1c0   :  { %v543_v35 = vadd.f32 %v1609_v34, %v1949_v4  ;;  %v534_v36 = vpop.f32.mrb[21].mxu1 }
 0x1c1   :  { %v535_v37 = vadd.f32 %v1949_v4, %v534_v36  ;;  %v1610_v38 = vpop.f32.mrb[22].mxu1  ;;  %1651 = vmatprep.mubr.bf16.mxu0 %v677_v33 }
 0x1c2   :  { %v546_v39 = vadd.f32 %v1610_v38, %v1949_v4  ;;  %v537_v40 = vpop.f32.mrb[23].mxu1  ;;  %1652 = vmatmul.mubr.bf16.vlgmr.msra.gmra.mrb[16].mxu0 %v678_v32  ;;  %v651_v42 = vmax.f32 %v543_v35, 0.0 }
 0x1c3   :  { %v538_v41 = vadd.f32 %v1949_v4, %v537_v40  ;;  %v649_v44 = vmax.f32 %v535_v37, 0.0 }
 0x1c4   :  { %v652_v43 = vmax.f32 %v546_v39, 0.0 }
 0x1c5   :  { %v650_v45 = vmax.f32 %v538_v41, 0.0 }
 0x1c6   :  { %v680_v46 = vpack.c.bf16 %v652_v43, %v651_v42 }
 0x1c7   :  { %v679_v47 = vpack.c.bf16 %v650_v45, %v649_v44  ;;  %v1613_v48 = vpop.f32.mrb[24].mxu1 }
 0x1c8   :  { %v559_v49 = vadd.f32 %v1613_v48, %v1949_v4  ;;  %v550_v50 = vpop.f32.mrb[25].mxu1 }
 0x1c9   :  { %v551_v51 = vadd.f32 %v1949_v4, %v550_v50  ;;  %v1614_v52 = vpop.f32.mrb[26].mxu1  ;;  %1655 = vmatprep.mubr.bf16.mxu0 %v679_v47 }
 0x1ca   :  { %v562_v53 = vadd.f32 %v1614_v52, %v1949_v4  ;;  %v553_v54 = vpop.f32.mrb[27].mxu1  ;;  %1656 = vmatmul.mubr.bf16.gmra.mrb[20].mxu0 %v680_v46  ;;  %v655_v56 = vmax.f32 %v559_v49, 0.0 }
 0x1cb   :  { %v554_v55 = vadd.f32 %v1949_v4, %v553_v54  ;;  %v653_v58 = vmax.f32 %v551_v51, 0.0 }
 0x1cc   :  { %v656_v57 = vmax.f32 %v562_v53, 0.0 }
 0x1cd   :  { %v654_v59 = vmax.f32 %v554_v55, 0.0 }
 0x1ce   :  { %v682_v60 = vpack.c.bf16 %v656_v57, %v655_v56 }
 0x1cf   :  { %v681_v61 = vpack.c.bf16 %v654_v59, %v653_v58  ;;  %v1617_v62 = vpop.f32.mrb[28].mxu1 }
 0x1d0   :  { %v575_v63 = vadd.f32 %v1617_v62, %v1949_v4  ;;  %v566_v0 = vpop.f32.mrb[29].mxu1 }
 0x1d1   :  { %v567_v1 = vadd.f32 %v1949_v4, %v566_v0  ;;  %v1618_v2 = vpop.f32.mrb[30].mxu1  ;;  %1659 = vmatprep.mubr.bf16.mxu0 %v681_v61 }
 0x1d2   :  { %v578_v3 = vadd.f32 %v1618_v2, %v1949_v4  ;;  %v569_v5 = vpop.f32.mrb[31].mxu1  ;;  %1660 = vmatmul.mubr.bf16.gmra.mrb[24].mxu0 %v682_v60  ;;  %v659_v8 = vmax.f32 %v575_v63, 0.0 }
 0x1d3   :  { %v570_v6 = vadd.f32 %v1949_v4, %v569_v5  ;;  %v657_v10 = vmax.f32 %v567_v1, 0.0 }
 0x1d4   :  { %v660_v9 = vmax.f32 %v578_v3, 0.0 }
 0x1d5   :  { %v658_v11 = vmax.f32 %v570_v6, 0.0  ;;  %v1986_v6 = vld [vmem:[%s2114_s6] ss:$0 sm:$0xff]  ;;  %s1745_s6 = smov [#allocation2]  }
 0x1d6   :  { %v684_v12 = vpack.c.bf16 %v660_v9, %v659_v8  ;;  %s1361_s19 = sshll.u32 %s1745_s6, 4  ;;  %s1362_s19 = int_to_ptr.vmem [resolvable:$true] %s1361_s19 }
 0x1d7   :  { %v683_v13 = vpack.c.bf16 %v658_v11, %v657_v10  ;;  %v1621_v14 = vpop.f32.mrb[32].mxu1  ;;  %s1721_s20 = scalar_lea.vmem %s1362_s19, 256  ;;  %p1726_p1 = scmp.lt.s32.totalorder %s1362_s19, %s1362_s19 }
 0x1d8   :  { %v591_v15 = vadd.f32 %v1621_v14, %v1949_v4  ;;  %v582_v16 = vpop.f32.mrb[33].mxu1  ;;  %p1722_p0 = scmp.ne.s32.totalorder %s1362_s19, %s1721_s20  ;;  %p1727_p2 = scmp.lt.s32.totalorder %s1721_s20, %s1721_s20 }
 0x1d9   :  { %v583_v17 = vadd.f32 %v1949_v4, %v582_v16  ;;  %v1622_v18 = vpop.f32.mrb[34].mxu1  ;;  %1663 = vmatprep.mubr.bf16.mxu0 %v683_v13 }
 0x1da   :  { %v594_v19 = vadd.f32 %v1622_v18, %v1949_v4  ;;  %v585_v31 = vpop.f32.mrb[35].mxu1  ;;  %1664 = vmatmul.mubr.bf16.gmra.mrb[28].mxu0 %v684_v12  ;;  %v663_v20 = vmax.f32 %v591_v15, 0.0  ;;  %p1728_p3 = por %p1727_p2, %p1726_p1 }
 0x1db   :  { %v586_v7 = vadd.f32 %v1949_v4, %v585_v31  ;;  %v661_v22 = vmax.f32 %v583_v17, 0.0 }
 0x1dc   :  { %v664_v21 = vmax.f32 %v594_v19, 0.0  ;;  %p1729_p4 = pnand %p1728_p3, %p1722_p0 }
 0x1dd   :  { %v662_v23 = vmax.f32 %v586_v7, 0.0 }
 0x1de   :  { %v686_v24 = vpack.c.bf16 %v664_v21, %v663_v20 }
 0x1df   :  { %v685_v25 = vpack.c.bf16 %v662_v23, %v661_v22  ;;  %v1625_v26 = vpop.f32.mrb[36].mxu1 }
 0x1e0   :  { %v607_v27 = vadd.f32 %v1625_v26, %v1949_v4  ;;  %v598_v28 = vpop.f32.mrb[37].mxu1 }
 0x1e1   :  { %v599_v29 = vadd.f32 %v1949_v4, %v598_v28  ;;  %v1626_v30 = vpop.f32.mrb[38].mxu1  ;;  %1667 = vmatprep.mubr.bf16.mxu0 %v685_v25 }
 0x1e2   :  { %v610_v32 = vadd.f32 %v1626_v30, %v1949_v4  ;;  %v601_v33 = vpop.f32.mrb[39].mxu1  ;;  %1668 = vmatmul.mubr.bf16.gmra.mrb[32].mxu0 %v686_v24  ;;  %v667_v35 = vmax.f32 %v607_v27, 0.0 }
 0x1e3   :  { %v602_v34 = vadd.f32 %v1949_v4, %v601_v33  ;;  %v665_v37 = vmax.f32 %v599_v29, 0.0 }
 0x1e4   :  { %v668_v36 = vmax.f32 %v610_v32, 0.0 }
 0x1e5   :  { %v666_v38 = vmax.f32 %v602_v34, 0.0 }
 0x1e6   :  { %v688_v39 = vpack.c.bf16 %v668_v36, %v667_v35 }
 0x1e7   :  { %v687_v40 = vpack.c.bf16 %v666_v38, %v665_v37  ;;  %v1629_v41 = vpop.f32.mrb[40].mxu1 }
 0x1e8   :  { %v623_v42 = vadd.f32 %v1629_v41, %v1949_v4  ;;  %v614_v43 = vpop.f32.mrb[41].mxu1 }
 0x1e9   :  { %v615_v44 = vadd.f32 %v1949_v4, %v614_v43  ;;  %v1630_v45 = vpop.f32.mrb[42].mxu1  ;;  %1671 = vmatprep.mubr.bf16.mxu0 %v687_v40 }
 0x1ea   :  { %v626_v46 = vadd.f32 %v1630_v45, %v1949_v4  ;;  %v617_v47 = vpop.f32.mrb[43].mxu1  ;;  %1672 = vmatmul.mubr.bf16.gmra.mrb[36].mxu0 %v688_v39  ;;  %v671_v49 = vmax.f32 %v623_v42, 0.0 }
 0x1eb   :  { %v618_v48 = vadd.f32 %v1949_v4, %v617_v47  ;;  %v669_v51 = vmax.f32 %v615_v44, 0.0 }
 0x1ec   :  { %v672_v50 = vmax.f32 %v626_v46, 0.0 }
 0x1ed   :  { %v670_v52 = vmax.f32 %v618_v48, 0.0 }
 0x1ee   :  { %v690_v53 = vpack.c.bf16 %v672_v50, %v671_v49 }
 0x1ef   :  { %v689_v54 = vpack.c.bf16 %v670_v52, %v669_v51  ;;  %v1633_v55 = vpop.f32.mrb[44].mxu1 }
 0x1f0   :  { %v639_v56 = vadd.f32 %v1633_v55, %v1949_v4  ;;  %v630_v57 = vpop.f32.mrb[45].mxu1 }
 0x1f1   :  { %v631_v58 = vadd.f32 %v1949_v4, %v630_v57  ;;  %v1634_v59 = vpop.f32.mrb[46].mxu1  ;;  %1675 = vmatprep.mubr.bf16.mxu0 %v689_v54 }
 0x1f2   :  { %v642_v60 = vadd.f32 %v1634_v59, %v1949_v4  ;;  %v633_v61 = vpop.f32.mrb[47].mxu1  ;;  %1676 = vmatmul.mubr.bf16.gmra.mrb[40].mxu0 %v690_v53  ;;  %v675_v63 = vmax.f32 %v639_v56, 0.0 }
 0x1f3   :  { %v634_v62 = vadd.f32 %v1949_v4, %v633_v61  ;;  %v673_v1 = vmax.f32 %v631_v58, 0.0 }
 0x1f4   :  { %v676_v0 = vmax.f32 %v642_v60, 0.0 }
 0x1f5   :  { %v674_v2 = vmax.f32 %v634_v62, 0.0 }
 0x1f6   :  { %v692_v3 = vpack.c.bf16 %v676_v0, %v675_v63 }
 0x1f7   :  { %v691_v5 = vpack.c.bf16 %v674_v2, %v673_v1 }
 0x1f9   :  { %1679 = vmatprep.mubr.bf16.mxu0 %v691_v5 }
 0x1fa   :  { %1680 = vmatmul.mubr.bf16.gmra.mrb[44].mxu0 %v692_v3 }
 0x295   :  { %v1653_v8 = vpop.f32.mrb[16].mxu0 }
 0x296   :  { %v807_v9 = vadd.f32 %v1653_v8, %v1986_v6  ;;  %v798_v10 = vpop.f32.mrb[17].mxu0 }
 0x297   :  { %v799_v11 = vadd.f32 %v1986_v6, %v798_v10  ;;  %v1654_v4 = vpop.f32.mrb[18].mxu0 }
 0x298   :  { %v927_v12 = vmax.f32 %v807_v9, 0.0  ;;  %v810_v13 = vadd.f32 %v1654_v4, %v1986_v6  ;;  %v801_v14 = vpop.f32.mrb[19].mxu0 }
 0x299   :  { %v925_v15 = vmax.f32 %v799_v11, 0.0  ;;  %v802_v16 = vadd.f32 %v1986_v6, %v801_v14 }
 0x29a   :  { %v969_v17 = vrot.slane %v927_v12, 4  ;;  %v928_v18 = vmax.f32 %v810_v13, 0.0 }
 0x29b   :  { %v957_v19 = vrot.slane %v925_v15, 4  ;;  %v926_v31 = vmax.f32 %v802_v16, 0.0 }
 0x29c   :  { %v970_v7 = vmax.f32 %v927_v12, %v969_v17  ;;  %v975_v20 = vrot.slane %v928_v18, 4 }
 0x29d   :  { %v958_v21 = vmax.f32 %v925_v15, %v957_v19  ;;  %v963_v22 = vrot.slane %v926_v31, 4  ;;  %v1657_v23 = vpop.f32.mrb[20].mxu0 }
 0x29e   :  { %v971_v24 = vrot.slane %v970_v7, 2  ;;  %v976_v25 = vmax.f32 %v928_v18, %v975_v20  ;;  %v823_v26 = vadd.f32 %v1657_v23, %v1986_v6  ;;  %v814_v27 = vpop.f32.mrb[21].mxu0 }
 0x29f   :  { %v959_v28 = vrot.slane %v958_v21, 2  ;;  %v964_v29 = vmax.f32 %v926_v31, %v963_v22  ;;  %v815_v30 = vadd.f32 %v1986_v6, %v814_v27  ;;  %v1658_v32 = vpop.f32.mrb[22].mxu0 }
 0x2a0   :  { %v972_v33 = vmax.f32 %v970_v7, %v971_v24  ;;  %v977_v34 = vrot.slane %v976_v25, 2  ;;  %v931_v35 = vmax.f32 %v823_v26, 0.0  ;;  %v826_v36 = vadd.f32 %v1658_v32, %v1986_v6  ;;  %v817_v37 = vpop.f32.mrb[23].mxu0 }
 0x2a1   :  { %v960_v38 = vmax.f32 %v958_v21, %v959_v28  ;;  %v965_v39 = vrot.slane %v964_v29, 2  ;;  %v929_v40 = vmax.f32 %v815_v30, 0.0  ;;  %v818_v41 = vadd.f32 %v1986_v6, %v817_v37 }
 0x2a2   :  { %v973_v42 = vrot.slane %v972_v33, 1  ;;  %v978_v43 = vmax.f32 %v976_v25, %v977_v34  ;;  %v993_v44 = vrot.slane %v931_v35, 4  ;;  %v932_v45 = vmax.f32 %v826_v36, 0.0 }
 0x2a3   :  { %v961_v46 = vrot.slane %v960_v38, 1  ;;  %v966_v47 = vmax.f32 %v964_v29, %v965_v39  ;;  %v981_v48 = vrot.slane %v929_v40, 4  ;;  %v930_v49 = vmax.f32 %v818_v41, 0.0 }
 0x2a4   :  { %v974_v50 = vmax.f32 %v972_v33, %v973_v42  ;;  %v979_v51 = vrot.slane %v978_v43, 1  ;;  %v994_v52 = vmax.f32 %v931_v35, %v993_v44  ;;  %v999_v53 = vrot.slane %v932_v45, 4 }
 0x2a5   :  { %v962_v54 = vmax.f32 %v960_v38, %v961_v46  ;;  %v967_v55 = vrot.slane %v966_v47, 1  ;;  %v982_v56 = vmax.f32 %v929_v40, %v981_v48  ;;  %v987_v57 = vrot.slane %v930_v49, 4  ;;  %v1661_v58 = vpop.f32.mrb[24].mxu0 }
 0x2a6   :  { %v1458_v59 = vpack.c.bf16 %v974_v50, %v974_v50  ;;  %v980_v60 = vmax.f32 %v978_v43, %v979_v51  ;;  %v995_v61 = vrot.slane %v994_v52, 2  ;;  %v1000_v62 = vmax.f32 %v932_v45, %v999_v53  ;;  %v830_v63 = vpop.f32.mrb[25].mxu0 }
 0x2a7   :  { %v1456_v0 = vpack.c.bf16 %v962_v54, %v962_v54  ;;  %v968_v1 = vmax.f32 %v966_v47, %v967_v55  ;;  %v983_v2 = vrot.slane %v982_v56, 2  ;;  %v988_v3 = vmax.f32 %v930_v49, %v987_v57  ;;  %v1662_v5 = vpop.f32.mrb[26].mxu0 }
 0x2a8   :  { %v1459_v8 = vpack.c.bf16 %v980_v60, %v980_v60  ;;  %v996_v9 = vmax.f32 %v994_v52, %v995_v61  ;;  %v1001_v10 = vrot.slane %v1000_v62, 2  ;;  %v833_v11 = vpop.f32.mrb[27].mxu0  ;;  %v1279_v4 = vunpack.c.l.b16 %v1458_v59 }
 0x2a9   :  { %v1457_v12 = vpack.c.bf16 %v968_v1, %v968_v1  ;;  %v984_v13 = vmax.f32 %v982_v56, %v983_v2  ;;  %v989_v14 = vrot.slane %v988_v3, 2  ;;  %v1277_v15 = vunpack.c.l.b16 %v1456_v0 }
 0x2aa   :  { %v1280_v16 = vunpack.c.l.b16 %v1459_v8  ;;  %v997_v17 = vrot.slane %v996_v9, 1  ;;  %v839_v18 = vadd.f32 %v1661_v58, %v1986_v6  ;;  %v831_v20 = vadd.f32 %v1986_v6, %v830_v63 }
 0x2ab   :  { %v1278_v19 = vunpack.c.l.b16 %v1457_v12  ;;  %v985_v31 = vrot.slane %v984_v13, 1  ;;  %v990_v7 = vmax.f32 %v988_v3, %v989_v14  ;;  %v1002_v22 = vmax.f32 %v1000_v62, %v1001_v10 }
 0x2ac   :  { %v998_v21 = vmax.f32 %v996_v9, %v997_v17  ;;  %v935_v23 = vmax.f32 %v839_v18, 0.0  ;;  %v842_v24 = vadd.f32 %v1662_v5, %v1986_v6  ;;  %v933_v28 = vmax.f32 %v831_v20, 0.0 }
 0x2ad   :  { %v1310_v25 = vsel %vm1309_vm1, %v1278_v19, %v1277_v15  ;;  %v986_v26 = vmax.f32 %v984_v13, %v985_v31  ;;  %v991_v27 = vrot.slane %v990_v7, 1  ;;  %v1665_v29 = vpop.f32.mrb[28].mxu0  ;;  %v1003_v40 = vrot.slane %v1002_v22, 1 }
 0x2ae   :  { %v1312_v30 = vsel %vm1311_vm2, %v1279_v4, %v1310_v25  ;;  %v1462_v32 = vpack.c.bf16 %v998_v21, %v998_v21  ;;  %v1017_v33 = vrot.slane %v935_v23, 4  ;;  %v846_v34 = vpop.f32.mrb[29].mxu0  ;;  %v1005_v38 = vrot.slane %v933_v28, 4 }
 0x2af   :  { %v1460_v35 = vpack.c.bf16 %v986_v26, %v986_v26  ;;  %v1314_v36 = vsel %vm1313_vm3, %v1280_v16, %v1312_v30  ;;  %v992_v37 = vmax.f32 %v990_v7, %v991_v27  ;;  %v1666_v39 = vpop.f32.mrb[30].mxu0  ;;  %v936_v42 = vmax.f32 %v842_v24, 0.0 }
 0x2b0   :  { %v1018_v41 = vmax.f32 %v935_v23, %v1017_v33  ;;  %v849_v43 = vpop.f32.mrb[31].mxu0  ;;  %v1006_v46 = vmax.f32 %v933_v28, %v1005_v38  ;;  %v834_v47 = vadd.f32 %v1986_v6, %v833_v11  ;;  %v1283_v48 = vunpack.c.l.b16 %v1462_v32 }
 0x2b1   :  { %v1281_v44 = vunpack.c.l.b16 %v1460_v35  ;;  %v1461_v45 = vpack.c.bf16 %v992_v37, %v992_v37  ;;  %v1023_v50 = vrot.slane %v936_v42, 4  ;;  %v855_v51 = vadd.f32 %v1665_v29, %v1986_v6 }
 0x2b2   :  { %v1019_v49 = vrot.slane %v1018_v41, 2  ;;  %v1007_v54 = vrot.slane %v1006_v46, 2  ;;  %v934_v55 = vmax.f32 %v834_v47, 0.0  ;;  %v847_v59 = vadd.f32 %v1986_v6, %v846_v34 }
 0x2b3   :  { %v1316_v52 = vsel %vm1315_vm4, %v1281_v44, %v1314_v36  ;;  %v1282_v53 = vunpack.c.l.b16 %v1461_v45  ;;  %v1024_v57 = vmax.f32 %v936_v42, %v1023_v50  ;;  %v939_v58 = vmax.f32 %v855_v51, 0.0 }
 0x2b4   :  { %v1020_v56 = vmax.f32 %v1018_v41, %v1019_v49  ;;  %v1008_v61 = vmax.f32 %v1006_v46, %v1007_v54  ;;  %v1011_v62 = vrot.slane %v934_v55, 4  ;;  %v858_v63 = vadd.f32 %v1666_v39, %v1986_v6 }
 0x2b5   :  { %v1318_v60 = vsel %vm1317_vm5, %v1282_v53, %v1316_v52  ;;  %v1669_v0 = vpop.f32.mrb[32].mxu0  ;;  %v1025_v3 = vrot.slane %v1024_v57, 2  ;;  %v1041_v5 = vrot.slane %v939_v58, 4  ;;  %v937_v11 = vmax.f32 %v847_v59, 0.0 }
 0x2b6   :  { %v2009_v1 = vsel %vm1319_vm6, %v1283_v48, %v1318_v60  ;;  %v1021_v2 = vrot.slane %v1020_v56, 1  ;;  %v862_v8 = vpop.f32.mrb[33].mxu0  ;;  %v1009_v9 = vrot.slane %v1008_v61, 1  ;;  %v1012_v10 = vmax.f32 %v934_v55, %v1011_v62 }
 0x2b7   :  { %v940_v4 = vmax.f32 %v858_v63, 0.0  ;;  %v1670_v12 = vpop.f32.mrb[34].mxu0  ;;  %v1026_v14 = vmax.f32 %v1024_v57, %v1025_v3  ;;  %v1042_v15 = vmax.f32 %v939_v58, %v1041_v5  ;;  %v850_v16 = vadd.f32 %v1986_v6, %v849_v43 }
 0x2b8   :  { %v1022_v13 = vmax.f32 %v1020_v56, %v1021_v2  ;;  %v2012_v17 = vpop.f32.mrb[35].mxu0  ;;  %v2014_v18 = vmax.f32 %v1002_v22, %v1003_v40  ;;  %v1013_v19 = vrot.slane %v1012_v10, 2  ;;  %v1029_v31 = vrot.slane %v937_v11, 4 }
 0x2b9   :  { %v1047_v7 = vrot.slane %v940_v4, 4  ;;  %v1010_v20 = vmax.f32 %v1008_v61, %v1009_v9  ;;  %v1027_v21 = vrot.slane %v1026_v14, 1  ;;  %v1043_v23 = vrot.slane %v1042_v15, 2 }
 0x2ba   :  { %v938_v24 = vmax.f32 %v850_v16, 0.0  ;;  %v1014_v25 = vmax.f32 %v1012_v10, %v1013_v19  ;;  %v1030_v26 = vmax.f32 %v937_v11, %v1029_v31  ;;  %v1466_v28 = vpack.c.bf16 %v1022_v13, %v1022_v13 }
 0x2bb   :  { %v1048_v27 = vmax.f32 %v940_v4, %v1047_v7  ;;  %v1028_v29 = vmax.f32 %v1026_v14, %v1027_v21  ;;  %v1044_v30 = vmax.f32 %v1042_v15, %v1043_v23  ;;  %v1463_v22 = vpack.c.bf16 %v2014_v18, %v2014_v18 }
 0x2bc   :  { %v1035_v32 = vrot.slane %v938_v24, 4  ;;  %v1015_v33 = vrot.slane %v1014_v25, 1  ;;  %v1031_v34 = vrot.slane %v1030_v26, 2  ;;  %v1464_v37 = vpack.c.bf16 %v1010_v20, %v1010_v20 }
 0x2bd   :  { %v1049_v35 = vrot.slane %v1048_v27, 2  ;;  %v1673_v36 = vpop.f32.mrb[36].mxu0  ;;  %v871_v39 = vadd.f32 %v1669_v0, %v1986_v6  ;;  %v1045_v42 = vrot.slane %v1044_v30, 1  ;;  %v863_v44 = vadd.f32 %v1986_v6, %v862_v8 }
 0x2be   :  { %v1036_v38 = vmax.f32 %v938_v24, %v1035_v32  ;;  %v878_v40 = vpop.f32.mrb[37].mxu0  ;;  %v1016_v41 = vmax.f32 %v1014_v25, %v1015_v33  ;;  %v1032_v43 = vmax.f32 %v1030_v26, %v1031_v34  ;;  %v1287_v46 = vunpack.c.l.b16 %v1466_v28 }
 0x2bf   :  { %v1674_v45 = vpop.f32.mrb[38].mxu0  ;;  %v1467_v47 = vpack.c.bf16 %v1028_v29, %v1028_v29  ;;  %v943_v49 = vmax.f32 %v871_v39, 0.0  ;;  %v2022_v53 = vmax.f32 %v1048_v27, %v1049_v35  ;;  %v941_v54 = vmax.f32 %v863_v44, 0.0 }
 0x2c0   :  { %v1037_v48 = vrot.slane %v1036_v38, 2  ;;  %v2020_v50 = vpop.f32.mrb[39].mxu0  ;;  %v1465_v51 = vpack.c.bf16 %v1016_v41, %v1016_v41  ;;  %v1033_v52 = vrot.slane %v1032_v43, 1  ;;  %v1285_v55 = vunpack.c.l.b16 %v1464_v37 }
 0x2c1   :  { %v1065_v57 = vrot.slane %v943_v49, 4  ;;  %v874_v58 = vadd.f32 %v1670_v12, %v1986_v6  ;;  %v1046_v60 = vmax.f32 %v1044_v30, %v1045_v42  ;;  %v1053_v62 = vrot.slane %v941_v54, 4 }
 0x2c2   :  { %v1038_v56 = vmax.f32 %v1036_v38, %v1037_v48  ;;  %v1286_v59 = vunpack.c.l.b16 %v1465_v51  ;;  %v1034_v61 = vmax.f32 %v1032_v43, %v1033_v52  ;;  %v1288_v63 = vunpack.c.l.b16 %v1467_v47 }
 0x2c3   :  { %v1066_v2 = vmax.f32 %v943_v49, %v1065_v57  ;;  %v944_v3 = vmax.f32 %v874_v58, 0.0  ;;  %v1051_v9 = vrot.slane %v2022_v53, 1  ;;  %v1054_v10 = vmax.f32 %v941_v54, %v1053_v62 }
 0x2c4   :  { %v1039_v0 = vrot.slane %v1038_v56, 1  ;;  %v1323_v5 = vsel %vm1309_vm1, %v1286_v59, %v1285_v55  ;;  %v1468_v8 = vpack.c.bf16 %v1034_v61, %v1034_v61  ;;  %v1470_v16 = vpack.c.bf16 %v1046_v60, %v1046_v60 }
 0x2c5   :  { %v1677_v11 = vpop.f32.mrb[40].mxu0  ;;  %v1324_v4 = vsel %vm1311_vm2, %v1287_v46, %v1323_v5  ;;  %v1067_v14 = vrot.slane %v1066_v2, 2  ;;  %v1071_v12 = vrot.slane %v944_v3, 4  ;;  %v1055_v7 = vrot.slane %v1054_v10, 2 }
 0x2c6   :  { %v1040_v13 = vmax.f32 %v1038_v56, %v1039_v0  ;;  %v894_v15 = vpop.f32.mrb[41].mxu0  ;;  %v1289_v19 = vunpack.c.l.b16 %v1468_v8  ;;  %v1325_v31 = vsel %vm1313_vm3, %v1288_v63, %v1324_v4  ;;  %v866_v25 = vadd.f32 %v1986_v6, %v2012_v17 }
 0x2c7   :  { %v2029_v20 = vpop.f32.mrb[42].mxu0  ;;  %v1068_v23 = vmax.f32 %v1066_v2, %v1067_v14  ;;  %v1072_v24 = vmax.f32 %v944_v3, %v1071_v12  ;;  %v1056_v28 = vmax.f32 %v1054_v10, %v1055_v7  ;;  %v887_v29 = vadd.f32 %v1673_v36, %v1986_v6 }
 0x2c8   :  { %v1469_v21 = vpack.c.bf16 %v1040_v13, %v1040_v13  ;;  %v2033_v26 = vpop.f32.mrb[43].mxu0  ;;  %v1326_v27 = vsel %vm1315_vm4, %v1289_v19, %v1325_v31  ;;  %v879_v30 = vadd.f32 %v1986_v6, %v878_v40  ;;  %v942_v35 = vmax.f32 %v866_v25, 0.0 }
 0x2c9   :  { %v1069_v33 = vrot.slane %v1068_v23, 1  ;;  %v1073_v34 = vrot.slane %v1072_v24, 2  ;;  %v1291_v37 = vunpack.c.l.b16 %v1470_v16  ;;  %v947_v38 = vmax.f32 %v887_v29, 0.0 }
 0x2ca   :  { %v1290_v32 = vunpack.c.l.b16 %v1469_v21  ;;  %v945_v39 = vmax.f32 %v879_v30, 0.0  ;;  %v890_v41 = vadd.f32 %v1674_v45, %v1986_v6  ;;  %v1057_v42 = vrot.slane %v1056_v28, 1 }
 0x2cb   :  { %v1074_v43 = vmax.f32 %v1072_v24, %v1073_v34  ;;  %v1059_v44 = vrot.slane %v942_v35, 4  ;;  %v1070_v36 = vmax.f32 %v1068_v23, %v1069_v33  ;;  %v1089_v47 = vrot.slane %v947_v38, 4 }
 0x2cc   :  { %v1327_v17 = vsel %vm1317_vm5, %v1290_v32, %v1326_v27  ;;  %v1077_v40 = vrot.slane %v945_v39, 4  ;;  %v948_v52 = vmax.f32 %v890_v41, 0.0  ;;  %v2050_v45 = vunpack.c.l.b16 %v1463_v22 }
 0x2cd   :  { %v2041_v46 = vsel %vm1319_vm6, %v1291_v37, %v1327_v17  ;;  %v2043_v48 = vpop.f32.mrb[44].mxu0  ;;  %v1075_v49 = vrot.slane %v1074_v43, 1  ;;  %v1060_v51 = vmax.f32 %v942_v35, %v1059_v44  ;;  %v1090_v55 = vmax.f32 %v947_v38, %v1089_v47 }
 0x2ce   :  { %v2045_v54 = vpop.f32.mrb[45].mxu0  ;;  %v1078_v56 = vmax.f32 %v945_v39, %v1077_v40  ;;  %v882_v57 = vadd.f32 %v1986_v6, %v2020_v50  ;;  %v2057_v59 = vmax.f32 %v2022_v53, %v1051_v9  ;;  %v1058_v60 = vmax.f32 %v1056_v28, %v1057_v42 }
 0x2cf   :  { %v2054_v58 = vpop.f32.mrb[46].mxu0  ;;  %v1061_v61 = vrot.slane %v1060_v51, 2  ;;  %v1095_v62 = vrot.slane %v948_v52, 4  ;;  %v1474_v0 = vpack.c.bf16 %v1070_v36, %v1070_v36  ;;  %v1091_v2 = vrot.slane %v1090_v55, 2 }
 0x2d0   :  { %v2059_v63 = vpop.f32.mrb[47].mxu0  ;;  %v1079_v18 = vrot.slane %v1078_v56, 2  ;;  %v946_v22 = vmax.f32 %v882_v57, 0.0  ;;  %v1076_v3 = vmax.f32 %v1074_v43, %v1075_v49  ;;  %v903_v10 = vadd.f32 %v1677_v11, %v1986_v6 }
 0x2d1   :  { %v1062_v5 = vmax.f32 %v1060_v51, %v1061_v61  ;;  %v1096_v8 = vmax.f32 %v948_v52, %v1095_v62  ;;  %v1092_v50 = vmax.f32 %v1090_v55, %v1091_v2  ;;  %v895_v53 = vadd.f32 %v1986_v6, %v894_v15 }
 0x2d2   :  { %v1080_v4 = vmax.f32 %v1078_v56, %v1079_v18  ;;  %v1083_v13 = vrot.slane %v946_v22, 4  ;;  %v1472_v9 = vpack.c.bf16 %v1058_v60, %v1058_v60  ;;  %v951_v16 = vmax.f32 %v903_v10, 0.0 }
 0x2d3   :  { %v1063_v14 = vrot.slane %v1062_v5, 1  ;;  %v1097_v12 = vrot.slane %v1096_v8, 2  ;;  %v1093_v19 = vrot.slane %v1092_v50, 1  ;;  %v949_v21 = vmax.f32 %v895_v53, 0.0 }
 0x2d4   :  { %v1081_v31 = vrot.slane %v1080_v4, 1  ;;  %v1084_v7 = vmax.f32 %v946_v22, %v1083_v13  ;;  %v1113_v25 = vrot.slane %v951_v16, 4  ;;  %v906_v27 = vadd.f32 %v2029_v20, %v1986_v6 }
 0x2d5   :  { %v1064_v23 = vmax.f32 %v1062_v5, %v1063_v14  ;;  %v1098_v24 = vmax.f32 %v1096_v8, %v1097_v12  ;;  %v1475_v11 = vpack.c.bf16 %v1076_v3, %v1076_v3  ;;  %v1101_v30 = vrot.slane %v949_v21, 4 }
 0x2d6   :  { %v1082_v28 = vmax.f32 %v1080_v4, %v1081_v31  ;;  %v1085_v29 = vrot.slane %v1084_v7, 2  ;;  %v1114_v33 = vmax.f32 %v951_v16, %v1113_v25  ;;  %v952_v34 = vmax.f32 %v906_v27, 0.0 }
 0x2d7   :  { %v1473_v32 = vpack.c.bf16 %v1064_v23, %v1064_v23  ;;  %v1099_v15 = vrot.slane %v1098_v24, 1  ;;  %v1293_v35 = vunpack.c.l.b16 %v1472_v9  ;;  %v1102_v39 = vmax.f32 %v949_v21, %v1101_v30 }
 0x2d8   :  { %v1476_v37 = vpack.c.bf16 %v1082_v28, %v1082_v28  ;;  %v1086_v38 = vmax.f32 %v1084_v7, %v1085_v29  ;;  %v1094_v17 = vmax.f32 %v1092_v50, %v1093_v19  ;;  %v1115_v42 = vrot.slane %v1114_v33, 2 }
 0x2d9   :  { %v1294_v41 = vunpack.c.l.b16 %v1473_v32  ;;  %v1119_v43 = vrot.slane %v952_v34, 4  ;;  %v1295_v44 = vunpack.c.l.b16 %v1474_v0  ;;  %v1103_v20 = vrot.slane %v1102_v39, 2 }
 0x2da   :  { %v1297_v36 = vunpack.c.l.b16 %v1476_v37  ;;  %v1087_v47 = vrot.slane %v1086_v38, 1  ;;  %v1296_v40 = vunpack.c.l.b16 %v1475_v11  ;;  %v1100_v51 = vmax.f32 %v1098_v24, %v1099_v15 }
 0x2db   :  { %v1330_v49 = vsel %vm1309_vm1, %v1294_v41, %v1293_v35  ;;  %v1120_v52 = vmax.f32 %v952_v34, %v1119_v43  ;;  %v1116_v57 = vmax.f32 %v1114_v33, %v1115_v42  ;;  %v898_v60 = vadd.f32 %v1986_v6, %v2033_v26 }
 0x2dc   :  { %v1331_v55 = vsel %vm1311_vm2, %v1295_v44, %v1330_v49  ;;  %v1088_v56 = vmax.f32 %v1086_v38, %v1087_v47  ;;  %v1478_v61 = vpack.c.bf16 %v1094_v17, %v1094_v17  ;;  %v1104_v0 = vmax.f32 %v1102_v39, %v1103_v20 }
 0x2dd   :  { %v1332_v62 = vsel %vm1313_vm3, %v1296_v40, %v1331_v55  ;;  %v1121_v2 = vrot.slane %v1120_v52, 2  ;;  %v1471_v18 = vpack.c.bf16 %v2057_v59, %v2057_v59  ;;  %v950_v5 = vmax.f32 %v898_v60, 0.0 }
 0x2de   :  { %v1333_v22 = vsel %vm1315_vm4, %v1297_v36, %v1332_v62  ;;  %v1477_v3 = vpack.c.bf16 %v1088_v56, %v1088_v56  ;;  %v1479_v8 = vpack.c.bf16 %v1100_v51, %v1100_v51  ;;  %v919_v50 = vadd.f32 %v2043_v48, %v1986_v6 }
 0x2df   :  { %v1122_v10 = vmax.f32 %v1120_v52, %v1121_v2  ;;  %v911_v26 = vadd.f32 %v1986_v6, %v2045_v54  ;;  %v1117_v13 = vrot.slane %v1116_v57, 1  ;;  %v1107_v53 = vrot.slane %v950_v5, 4 }
 0x2e0   :  { %v1298_v4 = vunpack.c.l.b16 %v1477_v3  ;;  %v922_v9 = vadd.f32 %v2054_v58, %v1986_v6  ;;  %v1299_v14 = vunpack.c.l.b16 %v1478_v61  ;;  %v1105_v59 = vrot.slane %v1104_v0, 1 }
 0x2e1   :  { %v955_v12 = vmax.f32 %v919_v50, 0.0  ;;  %v953_v16 = vmax.f32 %v911_v26, 0.0  ;;  %v1292_v19 = vunpack.c.l.b16 %v1471_v18  ;;  %v1108_v7 = vmax.f32 %v950_v5, %v1107_v53 }
 0x2e2   :  { %v1334_v31 = vsel %vm1317_vm5, %v1298_v4, %v1333_v22  ;;  %v956_v21 = vmax.f32 %v922_v9, 0.0  ;;  %v1300_v23 = vunpack.c.l.b16 %v1479_v8  ;;  %v1123_v24 = vrot.slane %v1122_v10, 1 }
 0x2e3   :  { %v1335_v48 = vsel %vm1319_vm6, %v1299_v14, %v1334_v31  ;;  %v1137_v54 = vrot.slane %v955_v12, 4  ;;  %v1118_v25 = vmax.f32 %v1116_v57, %v1117_v13  ;;  %v1109_v27 = vrot.slane %v1108_v7, 2 }
 0x2e4   :  { %v1125_v11 = vrot.slane %v953_v16, 4  ;;  %v1143_v28 = vrot.slane %v956_v21, 4  ;;  %v1106_v29 = vmax.f32 %v1104_v0, %v1105_v59  ;;  %v914_v30 = vadd.f32 %v1986_v6, %v2059_v63 }
 0x2e5   :  { %v1138_v58 = vmax.f32 %v955_v12, %v1137_v54  ;;  %v1322_v32 = vsel %vm1321_vm7, %v2050_v45, %v2009_v1  ;;  %v1110_v15 = vmax.f32 %v1108_v7, %v1109_v27  ;;  %v1329_v35 = vsel %vm1321_vm7, %v1292_v19, %v2041_v46 }
 0x2e6   :  { %v1126_v33 = vmax.f32 %v953_v16, %v1125_v11  ;;  %v1144_v34 = vmax.f32 %v956_v21, %v1143_v28  ;;  %v1124_v37 = vmax.f32 %v1122_v10, %v1123_v24  ;;  %v954_v39 = vmax.f32 %v914_v30, 0.0 }
 0x2e7   :  { %v1139_v38 = vrot.slane %v1138_v58, 2  ;;  %v1336_v41 = vsel %vm1321_vm7, %v1300_v23, %v1335_v48  ;;  %v1111_v17 = vrot.slane %v1110_v15, 1  ;;  %v1344_v44 = vpack.c.b16 %v1322_v32, %v1322_v32 }
 0x2e8   :  { %v1127_v42 = vrot.slane %v1126_v33, 2  ;;  %v1145_v43 = vrot.slane %v1144_v34, 2  ;;  %v1131_v63 = vrot.slane %v954_v39, 4  ;;  %v1345_v36 = vpack.c.b16 %v1329_v35, %v1329_v35 }
 0x2e9   :  { %v1140_v6 = vmax.f32 %v1138_v58, %v1139_v38  ;;  %v1346_v47 = vpack.c.b16 %v1336_v41, %v1336_v41  ;;  %v1480_v1 = vpack.c.bf16 %v1106_v29, %v1106_v29  ;;  %v1112_v45 = vmax.f32 %v1110_v15, %v1111_v17  ;;  %1352 = vst [vmem:[#allocation2] sm:$0xf] %v1344_v44 }
 0x2ea   :  { %v1128_v20 = vmax.f32 %v1126_v33, %v1127_v42  ;;  %v1146_v40 = vmax.f32 %v1144_v34, %v1145_v43  ;;  %v1482_v49 = vpack.c.bf16 %v1118_v25, %v1118_v25  ;;  %v1132_v46 = vmax.f32 %v954_v39, %v1131_v63  ;;  %1353 = vst [vmem:[#allocation2 + $0x4] sm:$0xf] %v1345_v36 }
 0x2eb   :  { %1354 = vst [vmem:[#allocation2 + $0x8] sm:$0xf] %v1346_v47  ;;  %v1483_v51 = vpack.c.bf16 %v1124_v37, %v1124_v37  ;;  %v1481_v52 = vpack.c.bf16 %v1112_v45, %v1112_v45  ;;  %v1141_v55 = vrot.slane %v1140_v6, 1  ;;  %v1301_v61 = vunpack.c.l.b16 %v1480_v1 }
 0x2ec   :  { %v1129_v56 = vrot.slane %v1128_v20, 1  ;;  %v1147_v57 = vrot.slane %v1146_v40, 1  ;;  %v1133_v60 = vrot.slane %v1132_v46, 2  ;;  %v1303_v2 = vunpack.c.l.b16 %v1482_v49 }
 0x2ed   :  { %v1302_v62 = vunpack.c.l.b16 %v1481_v52  ;;  %v1304_v22 = vunpack.c.l.b16 %v1483_v51  ;;  %v1142_v5 = vmax.f32 %v1140_v6, %v1141_v55 }
 0x2ee   :  { %v1130_v0 = vmax.f32 %v1128_v20, %v1129_v56  ;;  %v1134_v18 = vmax.f32 %v1132_v46, %v1133_v60  ;;  %v1148_v50 = vmax.f32 %v1146_v40, %v1147_v57 }
 0x2ef   :  { %v1337_v3 = vsel %vm1309_vm1, %v1302_v62, %v1301_v61  ;;  %v1486_v9 = vpack.c.bf16 %v1142_v5, %v1142_v5 }
 0x2f0   :  { %v1484_v8 = vpack.c.bf16 %v1130_v0, %v1130_v0  ;;  %v1338_v10 = vsel %vm1311_vm2, %v1303_v2, %v1337_v3  ;;  %v1135_v26 = vrot.slane %v1134_v18, 1  ;;  %v1487_v59 = vpack.c.bf16 %v1148_v50, %v1148_v50 }
 0x2f1   :  { %v1339_v13 = vsel %vm1313_vm3, %v1304_v22, %v1338_v10  ;;  %v1307_v19 = vunpack.c.l.b16 %v1486_v9 }
 0x2f2   :  { %v1305_v4 = vunpack.c.l.b16 %v1484_v8  ;;  %v1136_v53 = vmax.f32 %v1134_v18, %v1135_v26  ;;  %v1308_v31 = vunpack.c.l.b16 %v1487_v59 }
 0x2f4   :  { %v1340_v14 = vsel %vm1315_vm4, %v1305_v4, %v1339_v13  ;;  %v1485_v12 = vpack.c.bf16 %v1136_v53, %v1136_v53 }
 0x2f6   :  { %v1306_v16 = vunpack.c.l.b16 %v1485_v12 }
 0x2f8   :  { %v1341_v7 = vsel %vm1317_vm5, %v1306_v16, %v1340_v14 }
 0x2f9   :  { %v1342_v21 = vsel %vm1319_vm6, %v1307_v19, %v1341_v7 }
 0x2fa   :  { %v1343_v23 = vsel %vm1321_vm7, %v1308_v31, %v1342_v21 }
 0x2fb   :  { %v1347_v48 = vpack.c.b16 %v1343_v23, %v1343_v23 }
 0x2fd   :  { %1355 = vst [vmem:[#allocation2 + $0xc] sm:$0xf] %v1347_v48 }
 0x2fe   :  { %1732 = shalt.err (!%p1729_p4)
}
 0x2ff   :  { %s1733_s23 = scalar_lea.hbm %s2115_s7, 256 }
 0x300   :  { %p1734_p5 = scmp.ne.s32.totalorder %s2115_s7, %s1733_s23  ;;  %p1737_p6 = scmp.lt.u32.totalorder %s1733_s23, %s2115_s7 }
 0x302   :  { %p1739_p7 = pnand %p1737_p6, %p1734_p5 }
 0x304   :  { %1742 = shalt.err (!%p1739_p7)
}
 0x305   :  { %s1746_s27 = smov 64   ;;  %s1747_s28 = smov 4  }
 0x306   :  { %1367 = dma.vmem_to_hbm [thread:$0]  %s1362_s19, 256, %s2115_s7, [#allocation3], %s1746_s27, %s1746_s27, %s1747_s28  }
 0x307   :  { %1743 = dma.done.wait [#allocation3], 256  }
 0x308   :  { %1744 = vsyncadd [#allocation3], 4294967040 }
 0x309   :  { %1371 = vsyncpa [#allocation3], 1 }

</bundles_post_ra>
